<compile_context>
chip_gen: v7x
topology: tpu7x:2x2x1
jax: 0.10.0
libtpu: 0.0.40
codegen_flags: <defaults>
</compile_context>

<pallas_src>
from functools import partial

import jax
import jax.numpy as jnp
import numpy as np
from jax.experimental import pallas as pl
from jax.experimental.pallas import tpu as pltpu


def lstm_classifier_kernel(T, B,
                           x_ref, len_ref, wih_ref, b_in_ref,
                           wrec_ref, wout_ref, bout_ref,
                           probs_ref):
    """Bidirectional single-layer LSTM + Linear + softmax.

    x_ref:    (T*B, E) bf16  flattened embedded input (B already padded to 8k)
    len_ref:  (B, 1)   int32 sequence lengths (0 for pad rows)
    wih_ref:  (E, 8H)  bf16  fused input weights  [fwd i,f,o,g | bwd i,f,o,g]
    b_in_ref: (1, 8H)  f32   fused biases (b_ih + b_hh), same column order
    wrec_ref: (2H, 8H) bf16  block-diagonal recurrent weights
                             rows 0:H  x cols 0:4H  = whh_fwd,
                             rows H:2H x cols 4H:8H = whh_bwd, zeros elsewhere
    wout_ref: (2H, O)  bf16  output weights acting on [h_f | h_b]
    bout_ref: (1, O)   f32   output bias
    """
    H = wrec_ref.shape[0] // 2
    G = 4 * H

    # Hoisted input projection for BOTH directions: one (T*B, E) @ (E, 8H)
    # MXU matmul; cols [0:4H] = forward gates, [4H:8H] = backward gates.
    xp = (jnp.dot(x_ref[...], wih_ref[...], preferred_element_type=jnp.float32)
          + b_in_ref[...])                                          # (T*B, 8H) f32

    w_rec = wrec_ref[...]                                           # (2H, 8H) bf16

    # Validity masks hoisted off the serial chain: one lane-broadcast of the
    # lengths + T cheap compares, leaving only the selects inside the loop.
    lens_b = jnp.broadcast_to(len_ref[...], (B, H))                 # (B, H) int32
    masks = [lens_b > t for t in range(T)]                          # T x (B, H) bool

    h_cat = jnp.zeros((B, 2 * H), jnp.float32)                      # [h_f | h_b]
    h_f = jnp.zeros((B, H), jnp.float32)
    h_b = jnp.zeros((B, H), jnp.float32)
    c_f = jnp.zeros((B, H), jnp.float32)
    c_b = jnp.zeros((B, H), jnp.float32)

    # Fully-unrolled time loop (T is a small static constant).  Forward step s
    # and backward step T-1-s share one block-diagonal gate matmul, so there is
    # exactly ONE serial vmatmul issue per step.
    for s in range(T):
        tb = T - 1 - s
        g8 = jnp.dot(h_cat.astype(w_rec.dtype), w_rec,
                     preferred_element_type=jnp.float32)            # (B, 8H)
        # s*B / tb*B are multiples of 8 (B padded) -> aligned row slices.
        gf = g8[:, :G] + xp[s * B:(s + 1) * B, :G]                  # fwd gates
        gb = g8[:, G:] + xp[tb * B:(tb + 1) * B, G:]                # bwd gates

        # Gate order per direction: [i | f | o | g] -> one sigmoid over 3H,
        # one tanh over H, per direction.
        sf = jax.nn.sigmoid(gf[:, :3 * H])
        sb = jax.nn.sigmoid(gb[:, :3 * H])
        gg_f = jnp.tanh(gf[:, 3 * H:])
        gg_b = jnp.tanh(gb[:, 3 * H:])

        cf_n = sf[:, H:2 * H] * c_f + sf[:, :H] * gg_f
        cb_n = sb[:, H:2 * H] * c_b + sb[:, :H] * gg_b
        hf_n = sf[:, 2 * H:] * jnp.tanh(cf_n)
        hb_n = sb[:, 2 * H:] * jnp.tanh(cb_n)

        m_f, m_b = masks[s], masks[tb]                              # packed-seq validity
        c_f = jnp.where(m_f, cf_n, c_f)
        c_b = jnp.where(m_b, cb_n, c_b)
        h_f = jnp.where(m_f, hf_n, h_f)
        h_b = jnp.where(m_b, hb_n, h_b)
        h_cat = jnp.concatenate([h_f, h_b], axis=1)

    # h_n = cat(h_fwd, h_bwd); Linear; softmax.
    y = (jnp.dot(h_cat.astype(wout_ref.dtype), wout_ref[...],
                 preferred_element_type=jnp.float32) + bout_ref[...])
    y = y - jnp.max(y, axis=1, keepdims=True)
    e = jnp.exp(y)
    denom = jnp.sum(e, axis=1, keepdims=True)
    # approx=True would push this to the EUP; kept exact so row sums == 1.
    probs_ref[...] = e * pl.reciprocal(denom, approx=False)


def lstm_classifier_forward(sentences, lengths, params):
    """sentences: (T, B) int32 time-major; lengths: (B,) int32 (sorted desc)."""
    T, B = sentences.shape
    O = params["b_out_k"].shape[1]
    Bp = ((B + 7) // 8) * 8                      # pad batch to 8-sublane multiple

    sent_p = jnp.pad(sentences, ((0, 0), (0, Bp - B)), constant_values=1)  # pad_idx=1
    lens_p = jnp.pad(lengths.astype(jnp.int32), (0, Bp - B)).reshape(Bp, 1)

    # Embedding gather is glue outside the kernel; bf16 for MXU-rate matmuls.
    x = params["embedding"][sent_p.reshape(-1)].astype(jnp.bfloat16)       # (T*Bp, E)

    vmem = pl.BlockSpec(memory_space=pltpu.MemorySpace.VMEM)
    kernel = partial(lstm_classifier_kernel, T, Bp)
    probs = pl.pallas_call(
        kernel,
        out_shape=jax.ShapeDtypeStruct((Bp, O), jnp.float32),
        in_specs=[vmem] * 7,
        out_specs=vmem,
        compiler_params=pltpu.CompilerParams(vmem_limit_bytes=32 * 1024 * 1024),
    )(x, lens_p, params["wih_k"], params["b_in_k"], params["wrec_k"],
      params["wout_k"], params["b_out_k"])
    return probs[:B]


def init_params(key, vocab, E, H, O):
    """Raw PyTorch-layout params (for the reference) plus the fused kernel-layout
    weights, all built once at init (no per-call concat/transpose/cast)."""
    keys = jax.random.split(key, 11)
    embedding = jax.random.normal(keys[0], (vocab, E), jnp.float32)
    k = 1.0 / np.sqrt(H)

    def uni(kk, shape, bound):
        return jax.random.uniform(kk, shape, jnp.float32, -bound, bound)

    def direction(ks):
        # PyTorch nn.LSTM layout: weight_ih (4H, E), weight_hh (4H, H),
        # biases (4H,), gate order i, f, g, o along the 4H axis.
        return (uni(ks[0], (4 * H, E), k), uni(ks[1], (4 * H, H), k),
                uni(ks[2], (4 * H,), k), uni(ks[3], (4 * H,), k))

    raw_f = direction(keys[1:5])
    raw_b = direction(keys[5:9])

    ko = 1.0 / np.sqrt(2 * H)
    w_out = uni(keys[9], (O, 2 * H), ko)           # PyTorch nn.Linear layout
    b_out = uni(keys[10], (O,), ko)

    # ---- kernel layout (built once; gate order reordered i,f,g,o -> i,f,o,g) ----
    perm = np.concatenate([np.arange(0, H), np.arange(H, 2 * H),
                           np.arange(3 * H, 4 * H), np.arange(2 * H, 3 * H)])

    def kparams(raw):
        w_ih, w_hh, b_ih, b_hh = raw
        wih_k = w_ih[perm].T                       # (E, 4H) cols [i,f,o,g]
        whh_k = w_hh[perm].T                       # (H, 4H)
        b_k = (b_ih + b_hh)[perm][None, :]         # (1, 4H)
        return wih_k, whh_k, b_k

    wif, whf, bf_ = kparams(raw_f)
    wib, whb, bb_ = kparams(raw_b)

    wih_k = jnp.concatenate([wif, wib], axis=1).astype(jnp.bfloat16)       # (E, 8H)
    b_in_k = jnp.concatenate([bf_, bb_], axis=1)                           # (1, 8H) f32
    wrec_k = (jnp.zeros((2 * H, 8 * H), jnp.float32)
              .at[:H, :4 * H].set(whf)
              .at[H:, 4 * H:].set(whb)).astype(jnp.bfloat16)               # block-diag
    wout_k = w_out.T.astype(jnp.bfloat16)                                  # (2H, O)
    b_out_k = b_out[None, :]                                               # (1, O) f32

    return dict(embedding=embedding,
                raw_f=raw_f, raw_b=raw_b, w_out=w_out, b_out=b_out,
                wih_k=wih_k, b_in_k=b_in_k, wrec_k=wrec_k,
                wout_k=wout_k, b_out_k=b_out_k)


def reference_forward(sentences, lengths, params):
    """Plain-JAX reference (PyTorch gate order, bf16 matmul inputs, f32 accum)."""
    T, B = sentences.shape
    H = params["raw_f"][1].shape[1]
    x = params["embedding"][sentences].astype(jnp.bfloat16)                # (T, B, E)
    mask = jnp.arange(T)[:, None] < lengths[None, :]                       # (T, B)

    def run(order, raw):
        w_ih, w_hh, b_ih, b_hh = raw
        wih = w_ih.T.astype(jnp.bfloat16)
        whh = w_hh.T.astype(jnp.bfloat16)
        b = (b_ih + b_hh)[None, :]
        h = jnp.zeros((B, H), jnp.float32)
        c = jnp.zeros((B, H), jnp.float32)
        for t in order:
            gates = (jnp.dot(x[t], wih, preferred_element_type=jnp.float32)
                     + jnp.dot(h.astype(jnp.bfloat16), whh,
                               preferred_element_type=jnp.float32) + b)
            i = jax.nn.sigmoid(gates[:, :H])
            f = jax.nn.sigmoid(gates[:, H:2 * H])
            g = jnp.tanh(gates[:, 2 * H:3 * H])
            o = jax.nn.sigmoid(gates[:, 3 * H:])
            c_new = f * c + i * g
            h_new = o * jnp.tanh(c_new)
            m = mask[t][:, None]
            h = jnp.where(m, h_new, h)
            c = jnp.where(m, c_new, c)
        return h

    h_f = run(range(T), params["raw_f"])
    h_b = run(range(T - 1, -1, -1), params["raw_b"])
    h_n = jnp.concatenate([h_f, h_b], axis=1)
    y = (jnp.dot(h_n.astype(jnp.bfloat16),
                 params["w_out"].T.astype(jnp.bfloat16),
                 preferred_element_type=jnp.float32) + params["b_out"][None, :])
    return jax.nn.softmax(y, axis=1)


if __name__ == "__main__":
    V, E, H, O = 32, 16, 32, 8     # vocab, embedding_dim, hidden_dim, output_dim
    T, B = 8, 4                    # max seq length, batch size

    params = init_params(jax.random.PRNGKey(0), V, E, H, O)
    kd, _ = jax.random.split(jax.random.PRNGKey(1))
    sentences = jax.random.randint(kd, (T, B), 0, V, dtype=jnp.int32)
    lengths = jnp.array([8, 7, 5, 3], dtype=jnp.int32)   # sorted desc (enforce_sorted)

    probs = jax.block_until_ready(lstm_classifier_forward(sentences, lengths, params))
    ref = jax.block_until_ready(reference_forward(sentences, lengths, params))

    assert probs.shape == (B, O)
    np.testing.assert_allclose(np.asarray(probs), np.asarray(ref),
                               atol=2e-3, rtol=2e-3)
    assert np.allclose(np.asarray(probs).sum(axis=1), 1.0, atol=1e-4)
    print("KERNEL_OK")
</pallas_src>

<mosaic_0001>
module attributes {stable_mosaic.version = 11 : i64} {
  func.func @lstm_classifier_kernel(%arg0: memref<64x16xbf16, #tpu.memory_space<vmem>>, %arg1: memref<8x1xi32, #tpu.memory_space<vmem>>, %arg2: memref<16x256xbf16, #tpu.memory_space<vmem>>, %arg3: memref<1x256xf32, #tpu.memory_space<vmem>>, %arg4: memref<64x256xbf16, #tpu.memory_space<vmem>>, %arg5: memref<64x8xbf16, #tpu.memory_space<vmem>>, %arg6: memref<1x8xf32, #tpu.memory_space<vmem>>, %arg7: memref<8x8xf32, #tpu.memory_space<vmem>>) attributes {dimension_semantics = [], scalar_prefetch = 0 : i64, scratch_operands = 0 : i64, tpu.core_type = #tpu.core_type<tc>} {
    %c0 = arith.constant 0 : index
    %c0_0 = arith.constant 0 : index
    %0 = vector.load %arg0[%c0, %c0_0] : memref<64x16xbf16, #tpu.memory_space<vmem>>, vector<64x16xbf16>
    %c0_1 = arith.constant 0 : index
    %c0_2 = arith.constant 0 : index
    %1 = vector.load %arg2[%c0_1, %c0_2] : memref<16x256xbf16, #tpu.memory_space<vmem>>, vector<16x256xbf16>
    %cst = arith.constant dense<0.000000e+00> : vector<64x256xf32>
    %2 = tpu.matmul %0, %1, %cst {dimension_numbers = #tpu.dot_dimension_numbers<[1], [0], [0], [1], [0, 0, 1, 1], [], []>} : vector<64x16xbf16>, vector<16x256xbf16>, vector<64x256xf32> -> vector<64x256xf32>
    %c0_3 = arith.constant 0 : index
    %c0_4 = arith.constant 0 : index
    %3 = vector.load %arg3[%c0_3, %c0_4] : memref<1x256xf32, #tpu.memory_space<vmem>>, vector<1x256xf32>
    %4 = vector.broadcast %3 : vector<1x256xf32> to vector<64x256xf32>
    %5 = arith.addf %2, %4 : vector<64x256xf32>
    %c0_5 = arith.constant 0 : index
    %c0_6 = arith.constant 0 : index
    %6 = vector.load %arg4[%c0_5, %c0_6] : memref<64x256xbf16, #tpu.memory_space<vmem>>, vector<64x256xbf16>
    %c0_7 = arith.constant 0 : index
    %c0_8 = arith.constant 0 : index
    %7 = vector.load %arg1[%c0_7, %c0_8] : memref<8x1xi32, #tpu.memory_space<vmem>>, vector<8x1xi32>
    %8 = vector.shape_cast %7 : vector<8x1xi32> to vector<8x1xi32>
    %9 = vector.broadcast %8 : vector<8x1xi32> to vector<8x32xi32>
    %c0_i32 = arith.constant 0 : i32
    %10 = vector.broadcast %c0_i32 : i32 to vector<8x32xi32>
    %11 = arith.cmpi sgt, %9, %10 : vector<8x32xi32>
    %c1_i32 = arith.constant 1 : i32
    %12 = vector.broadcast %c1_i32 : i32 to vector<8x32xi32>
    %13 = arith.cmpi sgt, %9, %12 : vector<8x32xi32>
    %c2_i32 = arith.constant 2 : i32
    %14 = vector.broadcast %c2_i32 : i32 to vector<8x32xi32>
    %15 = arith.cmpi sgt, %9, %14 : vector<8x32xi32>
    %c3_i32 = arith.constant 3 : i32
    %16 = vector.broadcast %c3_i32 : i32 to vector<8x32xi32>
    %17 = arith.cmpi sgt, %9, %16 : vector<8x32xi32>
    %c4_i32 = arith.constant 4 : i32
    %18 = vector.broadcast %c4_i32 : i32 to vector<8x32xi32>
    %19 = arith.cmpi sgt, %9, %18 : vector<8x32xi32>
    %c5_i32 = arith.constant 5 : i32
    %20 = vector.broadcast %c5_i32 : i32 to vector<8x32xi32>
    %21 = arith.cmpi sgt, %9, %20 : vector<8x32xi32>
    %c6_i32 = arith.constant 6 : i32
    %22 = vector.broadcast %c6_i32 : i32 to vector<8x32xi32>
    %23 = arith.cmpi sgt, %9, %22 : vector<8x32xi32>
    %c7_i32 = arith.constant 7 : i32
    %24 = vector.broadcast %c7_i32 : i32 to vector<8x32xi32>
    %25 = arith.cmpi sgt, %9, %24 : vector<8x32xi32>
    %cst_9 = arith.constant 0.000000e+00 : f32
    %26 = vector.broadcast %cst_9 : f32 to vector<8x64xf32>
    %cst_10 = arith.constant 0.000000e+00 : f32
    %27 = vector.broadcast %cst_10 : f32 to vector<8x32xf32>
    %cst_11 = arith.constant 0.000000e+00 : f32
    %28 = vector.broadcast %cst_11 : f32 to vector<8x32xf32>
    %cst_12 = arith.constant 0.000000e+00 : f32
    %29 = vector.broadcast %cst_12 : f32 to vector<8x32xf32>
    %cst_13 = arith.constant 0.000000e+00 : f32
    %30 = vector.broadcast %cst_13 : f32 to vector<8x32xf32>
    %31 = arith.truncf %26 : vector<8x64xf32> to vector<8x64xbf16>
    %cst_14 = arith.constant dense<0.000000e+00> : vector<8x256xf32>
    %32 = tpu.matmul %31, %6, %cst_14 {dimension_numbers = #tpu.dot_dimension_numbers<[1], [0], [0], [1], [0, 0, 1, 1], [], []>} : vector<8x64xbf16>, vector<64x256xbf16>, vector<8x256xf32> -> vector<8x256xf32>
    %33 = vector.extract_strided_slice %32 {offsets = [0, 0], sizes = [8, 128], strides = [1, 1]} : vector<8x256xf32> to vector<8x128xf32>
    %34 = vector.extract_strided_slice %5 {offsets = [0, 0], sizes = [8, 128], strides = [1, 1]} : vector<64x256xf32> to vector<8x128xf32>
    %35 = arith.addf %33, %34 : vector<8x128xf32>
    %36 = vector.extract_strided_slice %32 {offsets = [0, 128], sizes = [8, 128], strides = [1, 1]} : vector<8x256xf32> to vector<8x128xf32>
    %37 = vector.extract_strided_slice %5 {offsets = [56, 128], sizes = [8, 128], strides = [1, 1]} : vector<64x256xf32> to vector<8x128xf32>
    %38 = arith.addf %36, %37 : vector<8x128xf32>
    %39 = vector.extract_strided_slice %35 {offsets = [0, 0], sizes = [8, 96], strides = [1, 1]} : vector<8x128xf32> to vector<8x96xf32>
    %40 = arith.negf %39 : vector<8x96xf32>
    %41 = math.exp %40 : vector<8x96xf32>
    %cst_15 = arith.constant 1.000000e+00 : f32
    %42 = vector.broadcast %cst_15 : f32 to vector<8x96xf32>
    %43 = arith.addf %42, %41 : vector<8x96xf32>
    %44 = arith.divf %42, %43 : vector<8x96xf32>
    %45 = vector.extract_strided_slice %38 {offsets = [0, 0], sizes = [8, 96], strides = [1, 1]} : vector<8x128xf32> to vector<8x96xf32>
    %46 = arith.negf %45 : vector<8x96xf32>
    %47 = math.exp %46 : vector<8x96xf32>
    %cst_16 = arith.constant 1.000000e+00 : f32
    %48 = vector.broadcast %cst_16 : f32 to vector<8x96xf32>
    %49 = arith.addf %48, %47 : vector<8x96xf32>
    %50 = arith.divf %48, %49 : vector<8x96xf32>
    %51 = vector.extract_strided_slice %35 {offsets = [0, 96], sizes = [8, 32], strides = [1, 1]} : vector<8x128xf32> to vector<8x32xf32>
    %52 = math.tanh %51 : vector<8x32xf32>
    %53 = vector.extract_strided_slice %38 {offsets = [0, 96], sizes = [8, 32], strides = [1, 1]} : vector<8x128xf32> to vector<8x32xf32>
    %54 = math.tanh %53 : vector<8x32xf32>
    %55 = vector.extract_strided_slice %44 {offsets = [0, 32], sizes = [8, 32], strides = [1, 1]} : vector<8x96xf32> to vector<8x32xf32>
    %56 = arith.mulf %55, %29 : vector<8x32xf32>
    %57 = vector.extract_strided_slice %44 {offsets = [0, 0], sizes = [8, 32], strides = [1, 1]} : vector<8x96xf32> to vector<8x32xf32>
    %58 = arith.mulf %57, %52 : vector<8x32xf32>
    %59 = arith.addf %56, %58 : vector<8x32xf32>
    %60 = vector.extract_strided_slice %50 {offsets = [0, 32], sizes = [8, 32], strides = [1, 1]} : vector<8x96xf32> to vector<8x32xf32>
    %61 = arith.mulf %60, %30 : vector<8x32xf32>
    %62 = vector.extract_strided_slice %50 {offsets = [0, 0], sizes = [8, 32], strides = [1, 1]} : vector<8x96xf32> to vector<8x32xf32>
    %63 = arith.mulf %62, %54 : vector<8x32xf32>
    %64 = arith.addf %61, %63 : vector<8x32xf32>
    %65 = vector.extract_strided_slice %44 {offsets = [0, 64], sizes = [8, 32], strides = [1, 1]} : vector<8x96xf32> to vector<8x32xf32>
    %66 = math.tanh %59 : vector<8x32xf32>
    %67 = arith.mulf %65, %66 : vector<8x32xf32>
    %68 = vector.extract_strided_slice %50 {offsets = [0, 64], sizes = [8, 32], strides = [1, 1]} : vector<8x96xf32> to vector<8x32xf32>
    %69 = math.tanh %64 : vector<8x32xf32>
    %70 = arith.mulf %68, %69 : vector<8x32xf32>
    %71 = arith.select %11, %59, %29 : vector<8x32xi1>, vector<8x32xf32>
    %72 = arith.select %25, %64, %30 : vector<8x32xi1>, vector<8x32xf32>
    %73 = arith.select %11, %67, %27 : vector<8x32xi1>, vector<8x32xf32>
    %74 = arith.select %25, %70, %28 : vector<8x32xi1>, vector<8x32xf32>
    %75 = tpu.concatenate %73, %74 in 1 : vector<8x32xf32>, vector<8x32xf32> -> vector<8x64xf32>
    %76 = arith.truncf %75 : vector<8x64xf32> to vector<8x64xbf16>
    %cst_17 = arith.constant dense<0.000000e+00> : vector<8x256xf32>
    %77 = tpu.matmul %76, %6, %cst_17 {dimension_numbers = #tpu.dot_dimension_numbers<[1], [0], [0], [1], [0, 0, 1, 1], [], []>} : vector<8x64xbf16>, vector<64x256xbf16>, vector<8x256xf32> -> vector<8x256xf32>
    %78 = vector.extract_strided_slice %77 {offsets = [0, 0], sizes = [8, 128], strides = [1, 1]} : vector<8x256xf32> to vector<8x128xf32>
    %79 = vector.extract_strided_slice %5 {offsets = [8, 0], sizes = [8, 128], strides = [1, 1]} : vector<64x256xf32> to vector<8x128xf32>
    %80 = arith.addf %78, %79 : vector<8x128xf32>
    %81 = vector.extract_strided_slice %77 {offsets = [0, 128], sizes = [8, 128], strides = [1, 1]} : vector<8x256xf32> to vector<8x128xf32>
    %82 = vector.extract_strided_slice %5 {offsets = [48, 128], sizes = [8, 128], strides = [1, 1]} : vector<64x256xf32> to vector<8x128xf32>
    %83 = arith.addf %81, %82 : vector<8x128xf32>
    %84 = vector.extract_strided_slice %80 {offsets = [0, 0], sizes = [8, 96], strides = [1, 1]} : vector<8x128xf32> to vector<8x96xf32>
    %85 = arith.negf %84 : vector<8x96xf32>
    %86 = math.exp %85 : vector<8x96xf32>
    %cst_18 = arith.constant 1.000000e+00 : f32
    %87 = vector.broadcast %cst_18 : f32 to vector<8x96xf32>
    %88 = arith.addf %87, %86 : vector<8x96xf32>
    %89 = arith.divf %87, %88 : vector<8x96xf32>
    %90 = vector.extract_strided_slice %83 {offsets = [0, 0], sizes = [8, 96], strides = [1, 1]} : vector<8x128xf32> to vector<8x96xf32>
    %91 = arith.negf %90 : vector<8x96xf32>
    %92 = math.exp %91 : vector<8x96xf32>
    %cst_19 = arith.constant 1.000000e+00 : f32
    %93 = vector.broadcast %cst_19 : f32 to vector<8x96xf32>
    %94 = arith.addf %93, %92 : vector<8x96xf32>
    %95 = arith.divf %93, %94 : vector<8x96xf32>
    %96 = vector.extract_strided_slice %80 {offsets = [0, 96], sizes = [8, 32], strides = [1, 1]} : vector<8x128xf32> to vector<8x32xf32>
    %97 = math.tanh %96 : vector<8x32xf32>
    %98 = vector.extract_strided_slice %83 {offsets = [0, 96], sizes = [8, 32], strides = [1, 1]} : vector<8x128xf32> to vector<8x32xf32>
    %99 = math.tanh %98 : vector<8x32xf32>
    %100 = vector.extract_strided_slice %89 {offsets = [0, 32], sizes = [8, 32], strides = [1, 1]} : vector<8x96xf32> to vector<8x32xf32>
    %101 = arith.mulf %100, %71 : vector<8x32xf32>
    %102 = vector.extract_strided_slice %89 {offsets = [0, 0], sizes = [8, 32], strides = [1, 1]} : vector<8x96xf32> to vector<8x32xf32>
    %103 = arith.mulf %102, %97 : vector<8x32xf32>
    %104 = arith.addf %101, %103 : vector<8x32xf32>
    %105 = vector.extract_strided_slice %95 {offsets = [0, 32], sizes = [8, 32], strides = [1, 1]} : vector<8x96xf32> to vector<8x32xf32>
    %106 = arith.mulf %105, %72 : vector<8x32xf32>
    %107 = vector.extract_strided_slice %95 {offsets = [0, 0], sizes = [8, 32], strides = [1, 1]} : vector<8x96xf32> to vector<8x32xf32>
    %108 = arith.mulf %107, %99 : vector<8x32xf32>
    %109 = arith.addf %106, %108 : vector<8x32xf32>
    %110 = vector.extract_strided_slice %89 {offsets = [0, 64], sizes = [8, 32], strides = [1, 1]} : vector<8x96xf32> to vector<8x32xf32>
    %111 = math.tanh %104 : vector<8x32xf32>
    %112 = arith.mulf %110, %111 : vector<8x32xf32>
    %113 = vector.extract_strided_slice %95 {offsets = [0, 64], sizes = [8, 32], strides = [1, 1]} : vector<8x96xf32> to vector<8x32xf32>
    %114 = math.tanh %109 : vector<8x32xf32>
    %115 = arith.mulf %113, %114 : vector<8x32xf32>
    %116 = arith.select %13, %104, %71 : vector<8x32xi1>, vector<8x32xf32>
    %117 = arith.select %23, %109, %72 : vector<8x32xi1>, vector<8x32xf32>
    %118 = arith.select %13, %112, %73 : vector<8x32xi1>, vector<8x32xf32>
    %119 = arith.select %23, %115, %74 : vector<8x32xi1>, vector<8x32xf32>
    %120 = tpu.concatenate %118, %119 in 1 : vector<8x32xf32>, vector<8x32xf32> -> vector<8x64xf32>
    %121 = arith.truncf %120 : vector<8x64xf32> to vector<8x64xbf16>
    %cst_20 = arith.constant dense<0.000000e+00> : vector<8x256xf32>
    %122 = tpu.matmul %121, %6, %cst_20 {dimension_numbers = #tpu.dot_dimension_numbers<[1], [0], [0], [1], [0, 0, 1, 1], [], []>} : vector<8x64xbf16>, vector<64x256xbf16>, vector<8x256xf32> -> vector<8x256xf32>
    %123 = vector.extract_strided_slice %122 {offsets = [0, 0], sizes = [8, 128], strides = [1, 1]} : vector<8x256xf32> to vector<8x128xf32>
    %124 = vector.extract_strided_slice %5 {offsets = [16, 0], sizes = [8, 128], strides = [1, 1]} : vector<64x256xf32> to vector<8x128xf32>
    %125 = arith.addf %123, %124 : vector<8x128xf32>
    %126 = vector.extract_strided_slice %122 {offsets = [0, 128], sizes = [8, 128], strides = [1, 1]} : vector<8x256xf32> to vector<8x128xf32>
    %127 = vector.extract_strided_slice %5 {offsets = [40, 128], sizes = [8, 128], strides = [1, 1]} : vector<64x256xf32> to vector<8x128xf32>
    %128 = arith.addf %126, %127 : vector<8x128xf32>
    %129 = vector.extract_strided_slice %125 {offsets = [0, 0], sizes = [8, 96], strides = [1, 1]} : vector<8x128xf32> to vector<8x96xf32>
    %130 = arith.negf %129 : vector<8x96xf32>
    %131 = math.exp %130 : vector<8x96xf32>
    %cst_21 = arith.constant 1.000000e+00 : f32
    %132 = vector.broadcast %cst_21 : f32 to vector<8x96xf32>
    %133 = arith.addf %132, %131 : vector<8x96xf32>
    %134 = arith.divf %132, %133 : vector<8x96xf32>
    %135 = vector.extract_strided_slice %128 {offsets = [0, 0], sizes = [8, 96], strides = [1, 1]} : vector<8x128xf32> to vector<8x96xf32>
    %136 = arith.negf %135 : vector<8x96xf32>
    %137 = math.exp %136 : vector<8x96xf32>
    %cst_22 = arith.constant 1.000000e+00 : f32
    %138 = vector.broadcast %cst_22 : f32 to vector<8x96xf32>
    %139 = arith.addf %138, %137 : vector<8x96xf32>
    %140 = arith.divf %138, %139 : vector<8x96xf32>
    %141 = vector.extract_strided_slice %125 {offsets = [0, 96], sizes = [8, 32], strides = [1, 1]} : vector<8x128xf32> to vector<8x32xf32>
    %142 = math.tanh %141 : vector<8x32xf32>
    %143 = vector.extract_strided_slice %128 {offsets = [0, 96], sizes = [8, 32], strides = [1, 1]} : vector<8x128xf32> to vector<8x32xf32>
    %144 = math.tanh %143 : vector<8x32xf32>
    %145 = vector.extract_strided_slice %134 {offsets = [0, 32], sizes = [8, 32], strides = [1, 1]} : vector<8x96xf32> to vector<8x32xf32>
    %146 = arith.mulf %145, %116 : vector<8x32xf32>
    %147 = vector.extract_strided_slice %134 {offsets = [0, 0], sizes = [8, 32], strides = [1, 1]} : vector<8x96xf32> to vector<8x32xf32>
    %148 = arith.mulf %147, %142 : vector<8x32xf32>
    %149 = arith.addf %146, %148 : vector<8x32xf32>
    %150 = vector.extract_strided_slice %140 {offsets = [0, 32], sizes = [8, 32], strides = [1, 1]} : vector<8x96xf32> to vector<8x32xf32>
    %151 = arith.mulf %150, %117 : vector<8x32xf32>
    %152 = vector.extract_strided_slice %140 {offsets = [0, 0], sizes = [8, 32], strides = [1, 1]} : vector<8x96xf32> to vector<8x32xf32>
    %153 = arith.mulf %152, %144 : vector<8x32xf32>
    %154 = arith.addf %151, %153 : vector<8x32xf32>
    %155 = vector.extract_strided_slice %134 {offsets = [0, 64], sizes = [8, 32], strides = [1, 1]} : vector<8x96xf32> to vector<8x32xf32>
    %156 = math.tanh %149 : vector<8x32xf32>
    %157 = arith.mulf %155, %156 : vector<8x32xf32>
    %158 = vector.extract_strided_slice %140 {offsets = [0, 64], sizes = [8, 32], strides = [1, 1]} : vector<8x96xf32> to vector<8x32xf32>
    %159 = math.tanh %154 : vector<8x32xf32>
    %160 = arith.mulf %158, %159 : vector<8x32xf32>
    %161 = arith.select %15, %149, %116 : vector<8x32xi1>, vector<8x32xf32>
    %162 = arith.select %21, %154, %117 : vector<8x32xi1>, vector<8x32xf32>
    %163 = arith.select %15, %157, %118 : vector<8x32xi1>, vector<8x32xf32>
    %164 = arith.select %21, %160, %119 : vector<8x32xi1>, vector<8x32xf32>
    %165 = tpu.concatenate %163, %164 in 1 : vector<8x32xf32>, vector<8x32xf32> -> vector<8x64xf32>
    %166 = arith.truncf %165 : vector<8x64xf32> to vector<8x64xbf16>
    %cst_23 = arith.constant dense<0.000000e+00> : vector<8x256xf32>
    %167 = tpu.matmul %166, %6, %cst_23 {dimension_numbers = #tpu.dot_dimension_numbers<[1], [0], [0], [1], [0, 0, 1, 1], [], []>} : vector<8x64xbf16>, vector<64x256xbf16>, vector<8x256xf32> -> vector<8x256xf32>
    %168 = vector.extract_strided_slice %167 {offsets = [0, 0], sizes = [8, 128], strides = [1, 1]} : vector<8x256xf32> to vector<8x128xf32>
    %169 = vector.extract_strided_slice %5 {offsets = [24, 0], sizes = [8, 128], strides = [1, 1]} : vector<64x256xf32> to vector<8x128xf32>
    %170 = arith.addf %168, %169 : vector<8x128xf32>
    %171 = vector.extract_strided_slice %167 {offsets = [0, 128], sizes = [8, 128], strides = [1, 1]} : vector<8x256xf32> to vector<8x128xf32>
    %172 = vector.extract_strided_slice %5 {offsets = [32, 128], sizes = [8, 128], strides = [1, 1]} : vector<64x256xf32> to vector<8x128xf32>
    %173 = arith.addf %171, %172 : vector<8x128xf32>
    %174 = vector.extract_strided_slice %170 {offsets = [0, 0], sizes = [8, 96], strides = [1, 1]} : vector<8x128xf32> to vector<8x96xf32>
    %175 = arith.negf %174 : vector<8x96xf32>
    %176 = math.exp %175 : vector<8x96xf32>
    %cst_24 = arith.constant 1.000000e+00 : f32
    %177 = vector.broadcast %cst_24 : f32 to vector<8x96xf32>
    %178 = arith.addf %177, %176 : vector<8x96xf32>
    %179 = arith.divf %177, %178 : vector<8x96xf32>
    %180 = vector.extract_strided_slice %173 {offsets = [0, 0], sizes = [8, 96], strides = [1, 1]} : vector<8x128xf32> to vector<8x96xf32>
    %181 = arith.negf %180 : vector<8x96xf32>
    %182 = math.exp %181 : vector<8x96xf32>
    %cst_25 = arith.constant 1.000000e+00 : f32
    %183 = vector.broadcast %cst_25 : f32 to vector<8x96xf32>
    %184 = arith.addf %183, %182 : vector<8x96xf32>
    %185 = arith.divf %183, %184 : vector<8x96xf32>
    %186 = vector.extract_strided_slice %170 {offsets = [0, 96], sizes = [8, 32], strides = [1, 1]} : vector<8x128xf32> to vector<8x32xf32>
    %187 = math.tanh %186 : vector<8x32xf32>
    %188 = vector.extract_strided_slice %173 {offsets = [0, 96], sizes = [8, 32], strides = [1, 1]} : vector<8x128xf32> to vector<8x32xf32>
    %189 = math.tanh %188 : vector<8x32xf32>
    %190 = vector.extract_strided_slice %179 {offsets = [0, 32], sizes = [8, 32], strides = [1, 1]} : vector<8x96xf32> to vector<8x32xf32>
    %191 = arith.mulf %190, %161 : vector<8x32xf32>
    %192 = vector.extract_strided_slice %179 {offsets = [0, 0], sizes = [8, 32], strides = [1, 1]} : vector<8x96xf32> to vector<8x32xf32>
    %193 = arith.mulf %192, %187 : vector<8x32xf32>
    %194 = arith.addf %191, %193 : vector<8x32xf32>
    %195 = vector.extract_strided_slice %185 {offsets = [0, 32], sizes = [8, 32], strides = [1, 1]} : vector<8x96xf32> to vector<8x32xf32>
    %196 = arith.mulf %195, %162 : vector<8x32xf32>
    %197 = vector.extract_strided_slice %185 {offsets = [0, 0], sizes = [8, 32], strides = [1, 1]} : vector<8x96xf32> to vector<8x32xf32>
    %198 = arith.mulf %197, %189 : vector<8x32xf32>
    %199 = arith.addf %196, %198 : vector<8x32xf32>
    %200 = vector.extract_strided_slice %179 {offsets = [0, 64], sizes = [8, 32], strides = [1, 1]} : vector<8x96xf32> to vector<8x32xf32>
    %201 = math.tanh %194 : vector<8x32xf32>
    %202 = arith.mulf %200, %201 : vector<8x32xf32>
    %203 = vector.extract_strided_slice %185 {offsets = [0, 64], sizes = [8, 32], strides = [1, 1]} : vector<8x96xf32> to vector<8x32xf32>
    %204 = math.tanh %199 : vector<8x32xf32>
    %205 = arith.mulf %203, %204 : vector<8x32xf32>
    %206 = arith.select %17, %194, %161 : vector<8x32xi1>, vector<8x32xf32>
    %207 = arith.select %19, %199, %162 : vector<8x32xi1>, vector<8x32xf32>
    %208 = arith.select %17, %202, %163 : vector<8x32xi1>, vector<8x32xf32>
    %209 = arith.select %19, %205, %164 : vector<8x32xi1>, vector<8x32xf32>
    %210 = tpu.concatenate %208, %209 in 1 : vector<8x32xf32>, vector<8x32xf32> -> vector<8x64xf32>
    %211 = arith.truncf %210 : vector<8x64xf32> to vector<8x64xbf16>
    %cst_26 = arith.constant dense<0.000000e+00> : vector<8x256xf32>
    %212 = tpu.matmul %211, %6, %cst_26 {dimension_numbers = #tpu.dot_dimension_numbers<[1], [0], [0], [1], [0, 0, 1, 1], [], []>} : vector<8x64xbf16>, vector<64x256xbf16>, vector<8x256xf32> -> vector<8x256xf32>
    %213 = vector.extract_strided_slice %212 {offsets = [0, 0], sizes = [8, 128], strides = [1, 1]} : vector<8x256xf32> to vector<8x128xf32>
    %214 = vector.extract_strided_slice %5 {offsets = [32, 0], sizes = [8, 128], strides = [1, 1]} : vector<64x256xf32> to vector<8x128xf32>
    %215 = arith.addf %213, %214 : vector<8x128xf32>
    %216 = vector.extract_strided_slice %212 {offsets = [0, 128], sizes = [8, 128], strides = [1, 1]} : vector<8x256xf32> to vector<8x128xf32>
    %217 = vector.extract_strided_slice %5 {offsets = [24, 128], sizes = [8, 128], strides = [1, 1]} : vector<64x256xf32> to vector<8x128xf32>
    %218 = arith.addf %216, %217 : vector<8x128xf32>
    %219 = vector.extract_strided_slice %215 {offsets = [0, 0], sizes = [8, 96], strides = [1, 1]} : vector<8x128xf32> to vector<8x96xf32>
    %220 = arith.negf %219 : vector<8x96xf32>
    %221 = math.exp %220 : vector<8x96xf32>
    %cst_27 = arith.constant 1.000000e+00 : f32
    %222 = vector.broadcast %cst_27 : f32 to vector<8x96xf32>
    %223 = arith.addf %222, %221 : vector<8x96xf32>
    %224 = arith.divf %222, %223 : vector<8x96xf32>
    %225 = vector.extract_strided_slice %218 {offsets = [0, 0], sizes = [8, 96], strides = [1, 1]} : vector<8x128xf32> to vector<8x96xf32>
    %226 = arith.negf %225 : vector<8x96xf32>
    %227 = math.exp %226 : vector<8x96xf32>
    %cst_28 = arith.constant 1.000000e+00 : f32
    %228 = vector.broadcast %cst_28 : f32 to vector<8x96xf32>
    %229 = arith.addf %228, %227 : vector<8x96xf32>
    %230 = arith.divf %228, %229 : vector<8x96xf32>
    %231 = vector.extract_strided_slice %215 {offsets = [0, 96], sizes = [8, 32], strides = [1, 1]} : vector<8x128xf32> to vector<8x32xf32>
    %232 = math.tanh %231 : vector<8x32xf32>
    %233 = vector.extract_strided_slice %218 {offsets = [0, 96], sizes = [8, 32], strides = [1, 1]} : vector<8x128xf32> to vector<8x32xf32>
    %234 = math.tanh %233 : vector<8x32xf32>
    %235 = vector.extract_strided_slice %224 {offsets = [0, 32], sizes = [8, 32], strides = [1, 1]} : vector<8x96xf32> to vector<8x32xf32>
    %236 = arith.mulf %235, %206 : vector<8x32xf32>
    %237 = vector.extract_strided_slice %224 {offsets = [0, 0], sizes = [8, 32], strides = [1, 1]} : vector<8x96xf32> to vector<8x32xf32>
    %238 = arith.mulf %237, %232 : vector<8x32xf32>
    %239 = arith.addf %236, %238 : vector<8x32xf32>
    %240 = vector.extract_strided_slice %230 {offsets = [0, 32], sizes = [8, 32], strides = [1, 1]} : vector<8x96xf32> to vector<8x32xf32>
    %241 = arith.mulf %240, %207 : vector<8x32xf32>
    %242 = vector.extract_strided_slice %230 {offsets = [0, 0], sizes = [8, 32], strides = [1, 1]} : vector<8x96xf32> to vector<8x32xf32>
    %243 = arith.mulf %242, %234 : vector<8x32xf32>
    %244 = arith.addf %241, %243 : vector<8x32xf32>
    %245 = vector.extract_strided_slice %224 {offsets = [0, 64], sizes = [8, 32], strides = [1, 1]} : vector<8x96xf32> to vector<8x32xf32>
    %246 = math.tanh %239 : vector<8x32xf32>
    %247 = arith.mulf %245, %246 : vector<8x32xf32>
    %248 = vector.extract_strided_slice %230 {offsets = [0, 64], sizes = [8, 32], strides = [1, 1]} : vector<8x96xf32> to vector<8x32xf32>
    %249 = math.tanh %244 : vector<8x32xf32>
    %250 = arith.mulf %248, %249 : vector<8x32xf32>
    %251 = arith.select %19, %239, %206 : vector<8x32xi1>, vector<8x32xf32>
    %252 = arith.select %17, %244, %207 : vector<8x32xi1>, vector<8x32xf32>
    %253 = arith.select %19, %247, %208 : vector<8x32xi1>, vector<8x32xf32>
    %254 = arith.select %17, %250, %209 : vector<8x32xi1>, vector<8x32xf32>
    %255 = tpu.concatenate %253, %254 in 1 : vector<8x32xf32>, vector<8x32xf32> -> vector<8x64xf32>
    %256 = arith.truncf %255 : vector<8x64xf32> to vector<8x64xbf16>
    %cst_29 = arith.constant dense<0.000000e+00> : vector<8x256xf32>
    %257 = tpu.matmul %256, %6, %cst_29 {dimension_numbers = #tpu.dot_dimension_numbers<[1], [0], [0], [1], [0, 0, 1, 1], [], []>} : vector<8x64xbf16>, vector<64x256xbf16>, vector<8x256xf32> -> vector<8x256xf32>
    %258 = vector.extract_strided_slice %257 {offsets = [0, 0], sizes = [8, 128], strides = [1, 1]} : vector<8x256xf32> to vector<8x128xf32>
    %259 = vector.extract_strided_slice %5 {offsets = [40, 0], sizes = [8, 128], strides = [1, 1]} : vector<64x256xf32> to vector<8x128xf32>
    %260 = arith.addf %258, %259 : vector<8x128xf32>
    %261 = vector.extract_strided_slice %257 {offsets = [0, 128], sizes = [8, 128], strides = [1, 1]} : vector<8x256xf32> to vector<8x128xf32>
    %262 = vector.extract_strided_slice %5 {offsets = [16, 128], sizes = [8, 128], strides = [1, 1]} : vector<64x256xf32> to vector<8x128xf32>
    %263 = arith.addf %261, %262 : vector<8x128xf32>
    %264 = vector.extract_strided_slice %260 {offsets = [0, 0], sizes = [8, 96], strides = [1, 1]} : vector<8x128xf32> to vector<8x96xf32>
    %265 = arith.negf %264 : vector<8x96xf32>
    %266 = math.exp %265 : vector<8x96xf32>
    %cst_30 = arith.constant 1.000000e+00 : f32
    %267 = vector.broadcast %cst_30 : f32 to vector<8x96xf32>
    %268 = arith.addf %267, %266 : vector<8x96xf32>
    %269 = arith.divf %267, %268 : vector<8x96xf32>
    %270 = vector.extract_strided_slice %263 {offsets = [0, 0], sizes = [8, 96], strides = [1, 1]} : vector<8x128xf32> to vector<8x96xf32>
    %271 = arith.negf %270 : vector<8x96xf32>
    %272 = math.exp %271 : vector<8x96xf32>
    %cst_31 = arith.constant 1.000000e+00 : f32
    %273 = vector.broadcast %cst_31 : f32 to vector<8x96xf32>
    %274 = arith.addf %273, %272 : vector<8x96xf32>
    %275 = arith.divf %273, %274 : vector<8x96xf32>
    %276 = vector.extract_strided_slice %260 {offsets = [0, 96], sizes = [8, 32], strides = [1, 1]} : vector<8x128xf32> to vector<8x32xf32>
    %277 = math.tanh %276 : vector<8x32xf32>
    %278 = vector.extract_strided_slice %263 {offsets = [0, 96], sizes = [8, 32], strides = [1, 1]} : vector<8x128xf32> to vector<8x32xf32>
    %279 = math.tanh %278 : vector<8x32xf32>
    %280 = vector.extract_strided_slice %269 {offsets = [0, 32], sizes = [8, 32], strides = [1, 1]} : vector<8x96xf32> to vector<8x32xf32>
    %281 = arith.mulf %280, %251 : vector<8x32xf32>
    %282 = vector.extract_strided_slice %269 {offsets = [0, 0], sizes = [8, 32], strides = [1, 1]} : vector<8x96xf32> to vector<8x32xf32>
    %283 = arith.mulf %282, %277 : vector<8x32xf32>
    %284 = arith.addf %281, %283 : vector<8x32xf32>
    %285 = vector.extract_strided_slice %275 {offsets = [0, 32], sizes = [8, 32], strides = [1, 1]} : vector<8x96xf32> to vector<8x32xf32>
    %286 = arith.mulf %285, %252 : vector<8x32xf32>
    %287 = vector.extract_strided_slice %275 {offsets = [0, 0], sizes = [8, 32], strides = [1, 1]} : vector<8x96xf32> to vector<8x32xf32>
    %288 = arith.mulf %287, %279 : vector<8x32xf32>
    %289 = arith.addf %286, %288 : vector<8x32xf32>
    %290 = vector.extract_strided_slice %269 {offsets = [0, 64], sizes = [8, 32], strides = [1, 1]} : vector<8x96xf32> to vector<8x32xf32>
    %291 = math.tanh %284 : vector<8x32xf32>
    %292 = arith.mulf %290, %291 : vector<8x32xf32>
    %293 = vector.extract_strided_slice %275 {offsets = [0, 64], sizes = [8, 32], strides = [1, 1]} : vector<8x96xf32> to vector<8x32xf32>
    %294 = math.tanh %289 : vector<8x32xf32>
    %295 = arith.mulf %293, %294 : vector<8x32xf32>
    %296 = arith.select %21, %284, %251 : vector<8x32xi1>, vector<8x32xf32>
    %297 = arith.select %15, %289, %252 : vector<8x32xi1>, vector<8x32xf32>
    %298 = arith.select %21, %292, %253 : vector<8x32xi1>, vector<8x32xf32>
    %299 = arith.select %15, %295, %254 : vector<8x32xi1>, vector<8x32xf32>
    %300 = tpu.concatenate %298, %299 in 1 : vector<8x32xf32>, vector<8x32xf32> -> vector<8x64xf32>
    %301 = arith.truncf %300 : vector<8x64xf32> to vector<8x64xbf16>
    %cst_32 = arith.constant dense<0.000000e+00> : vector<8x256xf32>
    %302 = tpu.matmul %301, %6, %cst_32 {dimension_numbers = #tpu.dot_dimension_numbers<[1], [0], [0], [1], [0, 0, 1, 1], [], []>} : vector<8x64xbf16>, vector<64x256xbf16>, vector<8x256xf32> -> vector<8x256xf32>
    %303 = vector.extract_strided_slice %302 {offsets = [0, 0], sizes = [8, 128], strides = [1, 1]} : vector<8x256xf32> to vector<8x128xf32>
    %304 = vector.extract_strided_slice %5 {offsets = [48, 0], sizes = [8, 128], strides = [1, 1]} : vector<64x256xf32> to vector<8x128xf32>
    %305 = arith.addf %303, %304 : vector<8x128xf32>
    %306 = vector.extract_strided_slice %302 {offsets = [0, 128], sizes = [8, 128], strides = [1, 1]} : vector<8x256xf32> to vector<8x128xf32>
    %307 = vector.extract_strided_slice %5 {offsets = [8, 128], sizes = [8, 128], strides = [1, 1]} : vector<64x256xf32> to vector<8x128xf32>
    %308 = arith.addf %306, %307 : vector<8x128xf32>
    %309 = vector.extract_strided_slice %305 {offsets = [0, 0], sizes = [8, 96], strides = [1, 1]} : vector<8x128xf32> to vector<8x96xf32>
    %310 = arith.negf %309 : vector<8x96xf32>
    %311 = math.exp %310 : vector<8x96xf32>
    %cst_33 = arith.constant 1.000000e+00 : f32
    %312 = vector.broadcast %cst_33 : f32 to vector<8x96xf32>
    %313 = arith.addf %312, %311 : vector<8x96xf32>
    %314 = arith.divf %312, %313 : vector<8x96xf32>
    %315 = vector.extract_strided_slice %308 {offsets = [0, 0], sizes = [8, 96], strides = [1, 1]} : vector<8x128xf32> to vector<8x96xf32>
    %316 = arith.negf %315 : vector<8x96xf32>
    %317 = math.exp %316 : vector<8x96xf32>
    %cst_34 = arith.constant 1.000000e+00 : f32
    %318 = vector.broadcast %cst_34 : f32 to vector<8x96xf32>
    %319 = arith.addf %318, %317 : vector<8x96xf32>
    %320 = arith.divf %318, %319 : vector<8x96xf32>
    %321 = vector.extract_strided_slice %305 {offsets = [0, 96], sizes = [8, 32], strides = [1, 1]} : vector<8x128xf32> to vector<8x32xf32>
    %322 = math.tanh %321 : vector<8x32xf32>
    %323 = vector.extract_strided_slice %308 {offsets = [0, 96], sizes = [8, 32], strides = [1, 1]} : vector<8x128xf32> to vector<8x32xf32>
    %324 = math.tanh %323 : vector<8x32xf32>
    %325 = vector.extract_strided_slice %314 {offsets = [0, 32], sizes = [8, 32], strides = [1, 1]} : vector<8x96xf32> to vector<8x32xf32>
    %326 = arith.mulf %325, %296 : vector<8x32xf32>
    %327 = vector.extract_strided_slice %314 {offsets = [0, 0], sizes = [8, 32], strides = [1, 1]} : vector<8x96xf32> to vector<8x32xf32>
    %328 = arith.mulf %327, %322 : vector<8x32xf32>
    %329 = arith.addf %326, %328 : vector<8x32xf32>
    %330 = vector.extract_strided_slice %320 {offsets = [0, 32], sizes = [8, 32], strides = [1, 1]} : vector<8x96xf32> to vector<8x32xf32>
    %331 = arith.mulf %330, %297 : vector<8x32xf32>
    %332 = vector.extract_strided_slice %320 {offsets = [0, 0], sizes = [8, 32], strides = [1, 1]} : vector<8x96xf32> to vector<8x32xf32>
    %333 = arith.mulf %332, %324 : vector<8x32xf32>
    %334 = arith.addf %331, %333 : vector<8x32xf32>
    %335 = vector.extract_strided_slice %314 {offsets = [0, 64], sizes = [8, 32], strides = [1, 1]} : vector<8x96xf32> to vector<8x32xf32>
    %336 = math.tanh %329 : vector<8x32xf32>
    %337 = arith.mulf %335, %336 : vector<8x32xf32>
    %338 = vector.extract_strided_slice %320 {offsets = [0, 64], sizes = [8, 32], strides = [1, 1]} : vector<8x96xf32> to vector<8x32xf32>
    %339 = math.tanh %334 : vector<8x32xf32>
    %340 = arith.mulf %338, %339 : vector<8x32xf32>
    %341 = arith.select %23, %329, %296 : vector<8x32xi1>, vector<8x32xf32>
    %342 = arith.select %13, %334, %297 : vector<8x32xi1>, vector<8x32xf32>
    %343 = arith.select %23, %337, %298 : vector<8x32xi1>, vector<8x32xf32>
    %344 = arith.select %13, %340, %299 : vector<8x32xi1>, vector<8x32xf32>
    %345 = tpu.concatenate %343, %344 in 1 : vector<8x32xf32>, vector<8x32xf32> -> vector<8x64xf32>
    %346 = arith.truncf %345 : vector<8x64xf32> to vector<8x64xbf16>
    %cst_35 = arith.constant dense<0.000000e+00> : vector<8x256xf32>
    %347 = tpu.matmul %346, %6, %cst_35 {dimension_numbers = #tpu.dot_dimension_numbers<[1], [0], [0], [1], [0, 0, 1, 1], [], []>} : vector<8x64xbf16>, vector<64x256xbf16>, vector<8x256xf32> -> vector<8x256xf32>
    %348 = vector.extract_strided_slice %347 {offsets = [0, 0], sizes = [8, 128], strides = [1, 1]} : vector<8x256xf32> to vector<8x128xf32>
    %349 = vector.extract_strided_slice %5 {offsets = [56, 0], sizes = [8, 128], strides = [1, 1]} : vector<64x256xf32> to vector<8x128xf32>
    %350 = arith.addf %348, %349 : vector<8x128xf32>
    %351 = vector.extract_strided_slice %347 {offsets = [0, 128], sizes = [8, 128], strides = [1, 1]} : vector<8x256xf32> to vector<8x128xf32>
    %352 = vector.extract_strided_slice %5 {offsets = [0, 128], sizes = [8, 128], strides = [1, 1]} : vector<64x256xf32> to vector<8x128xf32>
    %353 = arith.addf %351, %352 : vector<8x128xf32>
    %354 = vector.extract_strided_slice %350 {offsets = [0, 0], sizes = [8, 96], strides = [1, 1]} : vector<8x128xf32> to vector<8x96xf32>
    %355 = arith.negf %354 : vector<8x96xf32>
    %356 = math.exp %355 : vector<8x96xf32>
    %cst_36 = arith.constant 1.000000e+00 : f32
    %357 = vector.broadcast %cst_36 : f32 to vector<8x96xf32>
    %358 = arith.addf %357, %356 : vector<8x96xf32>
    %359 = arith.divf %357, %358 : vector<8x96xf32>
    %360 = vector.extract_strided_slice %353 {offsets = [0, 0], sizes = [8, 96], strides = [1, 1]} : vector<8x128xf32> to vector<8x96xf32>
    %361 = arith.negf %360 : vector<8x96xf32>
    %362 = math.exp %361 : vector<8x96xf32>
    %cst_37 = arith.constant 1.000000e+00 : f32
    %363 = vector.broadcast %cst_37 : f32 to vector<8x96xf32>
    %364 = arith.addf %363, %362 : vector<8x96xf32>
    %365 = arith.divf %363, %364 : vector<8x96xf32>
    %366 = vector.extract_strided_slice %350 {offsets = [0, 96], sizes = [8, 32], strides = [1, 1]} : vector<8x128xf32> to vector<8x32xf32>
    %367 = math.tanh %366 : vector<8x32xf32>
    %368 = vector.extract_strided_slice %353 {offsets = [0, 96], sizes = [8, 32], strides = [1, 1]} : vector<8x128xf32> to vector<8x32xf32>
    %369 = math.tanh %368 : vector<8x32xf32>
    %370 = vector.extract_strided_slice %359 {offsets = [0, 32], sizes = [8, 32], strides = [1, 1]} : vector<8x96xf32> to vector<8x32xf32>
    %371 = arith.mulf %370, %341 : vector<8x32xf32>
    %372 = vector.extract_strided_slice %359 {offsets = [0, 0], sizes = [8, 32], strides = [1, 1]} : vector<8x96xf32> to vector<8x32xf32>
    %373 = arith.mulf %372, %367 : vector<8x32xf32>
    %374 = arith.addf %371, %373 : vector<8x32xf32>
    %375 = vector.extract_strided_slice %365 {offsets = [0, 32], sizes = [8, 32], strides = [1, 1]} : vector<8x96xf32> to vector<8x32xf32>
    %376 = arith.mulf %375, %342 : vector<8x32xf32>
    %377 = vector.extract_strided_slice %365 {offsets = [0, 0], sizes = [8, 32], strides = [1, 1]} : vector<8x96xf32> to vector<8x32xf32>
    %378 = arith.mulf %377, %369 : vector<8x32xf32>
    %379 = arith.addf %376, %378 : vector<8x32xf32>
    %380 = vector.extract_strided_slice %359 {offsets = [0, 64], sizes = [8, 32], strides = [1, 1]} : vector<8x96xf32> to vector<8x32xf32>
    %381 = math.tanh %374 : vector<8x32xf32>
    %382 = arith.mulf %380, %381 : vector<8x32xf32>
    %383 = vector.extract_strided_slice %365 {offsets = [0, 64], sizes = [8, 32], strides = [1, 1]} : vector<8x96xf32> to vector<8x32xf32>
    %384 = math.tanh %379 : vector<8x32xf32>
    %385 = arith.mulf %383, %384 : vector<8x32xf32>
    %386 = arith.select %25, %382, %343 : vector<8x32xi1>, vector<8x32xf32>
    %387 = arith.select %11, %385, %344 : vector<8x32xi1>, vector<8x32xf32>
    %388 = tpu.concatenate %386, %387 in 1 : vector<8x32xf32>, vector<8x32xf32> -> vector<8x64xf32>
    %389 = arith.truncf %388 : vector<8x64xf32> to vector<8x64xbf16>
    %c0_38 = arith.constant 0 : index
    %c0_39 = arith.constant 0 : index
    %390 = vector.load %arg5[%c0_38, %c0_39] : memref<64x8xbf16, #tpu.memory_space<vmem>>, vector<64x8xbf16>
    %cst_40 = arith.constant dense<0.000000e+00> : vector<8x8xf32>
    %391 = tpu.matmul %389, %390, %cst_40 {dimension_numbers = #tpu.dot_dimension_numbers<[1], [0], [0], [1], [0, 0, 1, 1], [], []>} : vector<8x64xbf16>, vector<64x8xbf16>, vector<8x8xf32> -> vector<8x8xf32>
    %c0_41 = arith.constant 0 : index
    %c0_42 = arith.constant 0 : index
    %392 = vector.load %arg6[%c0_41, %c0_42] : memref<1x8xf32, #tpu.memory_space<vmem>>, vector<1x8xf32>
    %393 = vector.broadcast %392 : vector<1x8xf32> to vector<8x8xf32>
    %394 = arith.addf %391, %393 : vector<8x8xf32>
    %cst_43 = arith.constant dense<0xFF800000> : vector<8xf32>
    %395 = vector.multi_reduction <maximumf>, %394, %cst_43 [1] : vector<8x8xf32> to vector<8xf32>
    %396 = vector.shape_cast %395 : vector<8xf32> to vector<8x1xf32>
    %397 = vector.broadcast %396 : vector<8x1xf32> to vector<8x8xf32>
    %398 = arith.subf %394, %397 : vector<8x8xf32>
    %399 = math.exp %398 : vector<8x8xf32>
    %cst_44 = arith.constant dense<0.000000e+00> : vector<8xf32>
    %400 = vector.multi_reduction <add>, %399, %cst_44 [1] : vector<8x8xf32> to vector<8xf32>
    %401 = vector.shape_cast %400 : vector<8xf32> to vector<8x1xf32>
    %402 = tpu.reciprocal %401 : vector<8x1xf32> -> vector<8x1xf32>
    %403 = vector.broadcast %402 : vector<8x1xf32> to vector<8x8xf32>
    %404 = arith.mulf %399, %403 : vector<8x8xf32>
    %c0_45 = arith.constant 0 : index
    %c0_46 = arith.constant 0 : index
    %405 = vector.load %arg7[%c0_45, %c0_46] : memref<8x8xf32, #tpu.memory_space<vmem>>, vector<8x8xf32>
    tpu.vector_store %arg7[%c0_45, %c0_46], %404 {strides = array<i32>} : memref<8x8xf32, #tpu.memory_space<vmem>>, vector<8x8xf32>,
    return
  }
}

</mosaic_0001>

<bundles_post_ra>
// kernel: tpu_custom_call.1
= control target key start
LH: loop header
LB: loop body
LE: loop exit
PB: predicated region body
PF: predicated region fallthrough
CT: control target
= control target key end

     0   :  { %v1450_v2 = vmov 0   ;;  %vm80_vm0 = vcmask 130048   ;;  %s1977_s0 = inlined_call_operand.vmem [shape: bf16[64,16], index: 0, kind: input, shape index: {}]   ;;  %s1978_s1 = inlined_call_operand.vmem [shape: s32[8,1], index: 1, kind: input, shape index: {}]   ;;  %s1979_s2 = inlined_call_operand.vmem [shape: bf16[16,256], index: 2, kind: input, shape index: {}]   ;;  %s1980_s3 = inlined_call_operand.vmem [shape: f32[1,256], index: 3, kind: input, shape index: {}]   ;;  %s1981_s4 = inlined_call_operand.vmem [shape: bf16[64,256], index: 4, kind: input, shape index: {}]   ;;  %s1982_s5 = inlined_call_operand.vmem [shape: bf16[64,8], index: 5, kind: input, shape index: {}]   ;;  %s1983_s6 = inlined_call_operand.vmem [shape: f32[1,8], index: 6, kind: input, shape index: {}]   ;;  %s1984_s7 = inlined_call_operand.hbm [shape: f32[8,8], index: 7, kind: output, shape index: {}]  }
   0x1   :  { %v1271_v0 = vld [vmem:[%s1979_s2 + $0x4] ss:$8 sps:$4 sm:$0xff]   ;;  %125 = vmatprep.mubr.bf16.mxu0 %v1450_v2  ;;  %262 = vmatprep.mubr.bf16.mxu1 %v1450_v2  ;;  %v1275_v3 = vld [vmem:[%s1979_s2] ss:$8 sps:$4 sm:$0xff]   ;;  %v1524_v6 = vld [vmem:[%s1981_s4 + $0x14] ss:$8 sps:$4 sm:$0xff]  }
   0x2   :  { %v1503_v1 = vld [vmem:[%s1981_s4 + $0x4] ss:$8 sps:$4 sm:$0xff]   ;;  %93 = vmatprep.subr.bf16.mxu0 %v1271_v0  ;;  %v1513_v4 = vld [vmem:[%s1981_s4] ss:$8 sps:$4 sm:$0xff]   ;;  %1270 = vset.pattern.permute.xlu0 %v1450_v2  ;;  %v1529_v7 = vld [vmem:[%s1981_s4 + $0x10] ss:$8 sps:$4 sm:$0xff]  }
   0x3   :  { %230 = vmatprep.subr.bf16.mxu1 %v1503_v1  ;;  %v1277_v5 = vld [vmem:[%s1977_s0] sm:$0xff]   ;;  %94 = vmatpush1.bf16.msra.mxu0 %v1275_v3  ;;  %v1550_v10 = vld [vmem:[%s1981_s4 + $0x34] ss:$8 sps:$4 sm:$0xff]   ;;  %v1284_v11 = vld [vmem:[%s1977_s0 + $0x8] sm:$0xff]  }
   0x4   :  { %231 = vmatpush1.bf16.msra.mxu1 %v1513_v4  ;;  %v1534_v8 = vld [vmem:[%s1981_s4 + $0x24] ss:$8 sps:$4 sm:$0xff]   ;;  %447 = vmatprep.subr.bf16.mxu0 %v1503_v1  ;;  %v1543_v9 = vld [vmem:[%s1981_s4 + $0x20] ss:$8 sps:$4 sm:$0xff]   ;;  %v1559_v12 = vld [vmem:[%s1981_s4 + $0x30] ss:$8 sps:$4 sm:$0xff]  }
   0x5   :  { %232 = vmatprep.subr.bf16.mxu1 %v1524_v6 }
   0x6   :  { %1205 = vmatmul.mubr.msk.bf16.vlgmr.msra.gmra.mrb[0].mxu0 %vm80_vm0, %v1277_v5 }
   0x7   :  { %135 = vmatprep.mubr.bf16.mxu0 %v1450_v2  ;;  %448 = vmatpush1.bf16.msra.mxu0 %v1513_v4 }
   0x8   :  { %233 = vmatpush1.bf16.msra.mxu1 %v1529_v7  ;;  %449 = vmatprep.subr.bf16.mxu0 %v1524_v6 }
   0x9   :  { %234 = vmatprep.subr.bf16.mxu1 %v1534_v8 }
   0xb   :  { %450 = vmatpush1.bf16.msra.mxu0 %v1529_v7 }
   0xc   :  { %235 = vmatpush1.bf16.msra.mxu1 %v1543_v9 }
   0xd   :  { %236 = vmatprep.subr.bf16.mxu1 %v1550_v10 }
   0xe   :  { %12 = vsyncpa [#allocation3], 0  ;;  %451 = vmatprep.subr.bf16.mxu0 %v1534_v8  ;;  %1206 = vmatmul.mubr.msk.bf16.gmra.mrb[4].mxu0 %vm80_vm0, %v1284_v11  ;;  %v1288_v13 = vld [vmem:[%s1977_s0 + $0x10] sm:$0xff]   ;;  %v1289_v14 = vld [vmem:[%s1977_s0 + $0x18] sm:$0xff]   ;;  %v40_v15 = vlaneseq  ;;  %s1451_s0 = smov 32   ;;  %s1453_s30 = smov 96  }
   0xf   :  { %145 = vmatprep.mubr.bf16.mxu0 %v1450_v2  ;;  %452 = vmatpush1.bf16.msra.mxu0 %v1543_v9  ;;  %v38_v18 = vld [vmem:[%s1980_s3] sm:$0x3]  ;;  %vm333_vm3 = vcmask 261120   ;;  %vm226_vm4 = vcmask 523264   ;;  %vm1455_vm11 = vmmov 0   ;;  %vm1172_vm12 = vcmask 64512  }
  0x10   :  { %237 = vmatpush1.bf16.msra.mxu1 %v1559_v12  ;;  %453 = vmatprep.subr.bf16.mxu0 %v1550_v10  ;;  %v41_v16 = vshrl.u32 %v40_v15, 7  ;;  %v174_v62 = vld [vmem:[%s1978_s1] sm:$0xff]  ;;  %s1452_s1 = smov 64  }
  0x11   :  { %339 = vmatprep.subr.bf16.mxu1 %v1503_v1 }
  0x12   :  { %v46_v17 = vsub.s32 1, %v41_v16  ;;  %v42_v19 = vsub.s32 0, %v41_v16 }
  0x13   :  { %263 = vmatmul.mubr.bf16.vlgmr.msra.gmra.mrb[0].mxu1 %v1450_v2  ;;  %454 = vmatpush1.bf16.msra.mxu0 %v1559_v12 }
  0x14   :  { %340 = vmatpush1.bf16.msra.mxu1 %v1513_v4  ;;  %371 = vmatprep.mubr.bf16.mxu1 %v1450_v2  ;;  %v47_v20 = vrot.slane %v38_v18, %v46_v17  ;;  %v43_v22 = vrot.slane %v38_v18, %v42_v19 }
  0x15   :  { %341 = vmatprep.subr.bf16.mxu1 %v1524_v6  ;;  %663 = vmatprep.subr.bf16.mxu0 %v1503_v1 }
  0x16   :  { %1207 = vmatmul.mubr.msk.bf16.gmra.mrb[8].mxu0 %vm80_vm0, %v1288_v13 }
  0x17   :  { %155 = vmatprep.mubr.bf16.mxu0 %v1450_v2 }
  0x18   :  { %342 = vmatpush1.bf16.msra.mxu1 %v1529_v7 }
  0x19   :  { %343 = vmatprep.subr.bf16.mxu1 %v1534_v8 }
  0x1c   :  { %344 = vmatpush1.bf16.msra.mxu1 %v1543_v9 }
  0x1d   :  { %345 = vmatprep.subr.bf16.mxu1 %v1550_v10 }
  0x1e   :  { %1208 = vmatmul.mubr.msk.bf16.gmra.mrb[12].mxu0 %vm80_vm0, %v1289_v14 }
  0x1f   :  { %479 = vmatprep.mubr.bf16.mxu0 %v1450_v2 }
  0x20   :  { %346 = vmatpush1.bf16.msra.mxu1 %v1559_v12 }
  0x21   :  { %555 = vmatprep.subr.bf16.mxu1 %v1503_v1 }
  0xd9   :  { %v127_v21 = vpop.f32.mrb[0].mxu0 }
  0xda   :  { %v129_v23 = vpop.f32.mrb[1].mxu0  ;;  %v128_v34 = vadd.f32 %v127_v21, %v43_v22 }
  0xdb   :  { %v1597_v24 = vadd.f32 %v129_v23, %v47_v20  ;;  %v131_v25 = vpop.f32.mrb[2].mxu0 }
  0xdc   :  { %v1599_v26 = vadd.f32 %v131_v25, %v43_v22  ;;  %v133_v27 = vpop.f32.mrb[3].mxu0 }
  0xdd   :  { %v1601_v28 = vadd.f32 %v133_v27, %v47_v20 }
  0xe1   :  { %v137_v29 = vpop.f32.mrb[4].mxu0 }
  0xe2   :  { %v1603_v30 = vadd.f32 %v137_v29, %v43_v22  ;;  %v139_v31 = vpop.f32.mrb[5].mxu0 }
  0xe3   :  { %v1605_v32 = vadd.f32 %v139_v31, %v47_v20  ;;  %v141_v33 = vpop.f32.mrb[6].mxu0 }
  0xe4   :  { %v1607_v35 = vadd.f32 %v141_v33, %v43_v22  ;;  %v143_v36 = vpop.f32.mrb[7].mxu0 }
  0xe5   :  { %v1609_v37 = vadd.f32 %v143_v36, %v47_v20 }
  0xe6   :  { %v264_v38 = vpop.f32.mrb[0].mxu1 }
  0xe7   :  { %v271_v39 = vadd.f32 %v264_v38, %v128_v34  ;;  %v266_v40 = vpop.f32.mrb[1].mxu1 }
  0xe8   :  { %v268_v41 = vpop.f32.mrb[2].mxu1 }
  0xe9   :  { %1294 = vtanh.f32 %v271_v39  ;;  %v269_v42 = vpop.f32.mrb[3].mxu1  ;;  %v147_v43 = vpop.f32.mrb[8].mxu0  ;;  %v1217_v63 = vmul.f32 -1.442695, %v271_v39 }
  0xea   :  { %v1611_v44 = vadd.f32 %v147_v43, %v43_v22  ;;  %v149_v45 = vpop.f32.mrb[9].mxu0 }
  0xeb   :  { %v1613_v46 = vadd.f32 %v149_v45, %v47_v20  ;;  %v151_v47 = vpop.f32.mrb[10].mxu0 }
  0xec   :  { %v1615_v48 = vadd.f32 %v151_v47, %v43_v22  ;;  %v153_v49 = vpop.f32.mrb[11].mxu0 }
  0xed   :  { %v1617_v50 = vadd.f32 %v153_v49, %v47_v20 }
  0xf1   :  { %v157_v51 = vpop.f32.mrb[12].mxu0 }
  0xf2   :  { %v1619_v53 = vadd.f32 %v157_v51, %v43_v22  ;;  %v159_v54 = vpop.f32.mrb[13].mxu0 }
  0xf3   :  { %v1295_v52 = vpop.eup %1294  ;;  %v1621_v55 = vadd.f32 %v159_v54, %v47_v20  ;;  %v161_v56 = vpop.f32.mrb[14].mxu0 }
  0xf4   :  { %289 = vrot.lane.b32.xlu0 %v1295_v52, %s1451_s0  ;;  %v1624_v57 = vadd.f32 %v161_v56, %v43_v22  ;;  %v163_v58 = vpop.f32.mrb[15].mxu0 }
  0xf5   :  { %v164_v59 = vadd.f32 %v163_v58, %v47_v20 }
  0xf7   :  { %v272_v60 = vadd.f32 %v266_v40, %v164_v59 }
  0xf9   :  { %1296 = vtanh.f32 %v272_v60  ;;  %v1218_v5 = vmul.f32 -1.442695, %v272_v60 }
  0xfa   :  { %1298 = vpow2.f32 %v1217_v63 }
 0x103   :  { %v1297_v61 = vpop.eup %1296 }
 0x104   :  { %300 = vrot.lane.b32.xlu0 %v1297_v61, %s1451_s0  ;;  %v1299_v0 = vpop.eup %1298 }
 0x105   :  { %v276_v3 = vadd.f32 1.0, %v1299_v0 }
 0x107   :  { %1300 = vrcp.f32 %v276_v3 }
 0x108   :  { %176 = vperm.xlu0 %1270, %v174_v62   ;;  %1302 = vpow2.f32 %v1218_v5 }
 0x111   :  { %v1301_v11 = vpop.eup %1300 }
 0x112   :  { %v1303_v13 = vpop.eup %1302  ;;  %v287_v20 = vmul.f32 0.0, %v1301_v11 }
 0x113   :  { %v282_v16 = vadd.f32 1.0, %v1303_v13 }
 0x115   :  { %1304 = vrcp.f32 %v282_v16 }
 0x11f   :  { %v1305_v17 = vpop.eup %1304 }
 0x120   :  { %v298_v25 = vmul.f32 0.0, %v1305_v17 }
 0x166   :  { %v290_v14 = vpop.permute.xlu0 %289 }
 0x167   :  { %v292_v15 = vmul.f32 %v1301_v11, %v290_v14 }
 0x169   :  { %294 = vrot.lane.b32.xlu1 %v292_v15, %s1451_s0 }
 0x176   :  { %v301_v18 = vpop.permute.xlu0 %300 }
 0x177   :  { %v303_v19 = vmul.f32 %v1305_v17, %v301_v18 }
 0x179   :  { %305 = vrot.lane.b32.xlu1 %v303_v19, %s1451_s0 }
 0x187   :  { %v1640_v33 = vpop.permute.xlu0 %176 }
 0x188   :  { %vm178_vm1 = vcmp.gt.s32.totalorder %v1640_v33, 0  ;;  %vm185_vm2 = vcmp.gt.s32.totalorder %v1640_v33, 7  ;;  %vm179_vm5 = vcmp.gt.s32.totalorder %v1640_v33, 1  ;;  %vm184_vm6 = vcmp.gt.s32.totalorder %v1640_v33, 6 }
 0x189   :  { %vm180_vm7 = vcmp.gt.s32.totalorder %v1640_v33, 2  ;;  %vm183_vm8 = vcmp.gt.s32.totalorder %v1640_v33, 5  ;;  %vm181_vm9 = vcmp.gt.s32.totalorder %v1640_v33, 3  ;;  %vm182_vm10 = vcmp.gt.s32.totalorder %v1640_v33, 4 }
 0x1db   :  { %v295_v21 = vpop.permute.xlu1 %294 }
 0x1dc   :  { %v1632_v22 = vadd.f32 %v295_v21, %v287_v20 }
 0x1de   :  { %1306 = vtanh.f32 %v1632_v22  ;;  %v1676_v16 = vsel %vm178_vm1, %v1632_v22, 0.0 }
 0x1e8   :  { %v1307_v23 = vpop.eup %1306 }
 0x1e9   :  { %311 = vrot.lane.b32.xlu1 %v1307_v23, %s1451_s0 }
 0x1eb   :  { %v306_v27 = vpop.permute.xlu1 %305 }
 0x1ec   :  { %v1636_v29 = vadd.f32 %v306_v27, %v298_v25 }
 0x1ee   :  { %1308 = vtanh.f32 %v1636_v29 }
 0x1f8   :  { %v1309_v31 = vpop.eup %1308 }
 0x1f9   :  { %317 = vrot.lane.b32.xlu1 %v1309_v31, %s1451_s0 }
 0x25b   :  { %v312_v34 = vpop.permute.xlu1 %311 }
 0x25c   :  { %v314_v36 = vmul.f32 %v1301_v11, %v312_v34 }
 0x25e   :  { %v1645_v38 = vsel %vm178_vm1, %v314_v36, 0.0 }
 0x25f   :  { %326 = vrot.lane.b32.xlu0 %v1645_v38, %s1452_s1 }
 0x26b   :  { %v318_v39 = vpop.permute.xlu1 %317 }
 0x26c   :  { %v320_v40 = vmul.f32 %v1305_v17, %v318_v39  ;;  %v1681_v17 = vsel %vm185_vm2, %v1636_v29, 0.0 }
 0x26e   :  { %v1652_v41 = vsel %vm185_vm2, %v320_v40, 0.0 }
 0x26f   :  { %330 = vrot.lane.b32.xlu1 %v1652_v41, %s1453_s30 }
 0x2d1   :  { %v327_v42 = vpop.permute.xlu0 %326 }
 0x2e1   :  { %v331_v43 = vpop.permute.xlu1 %330 }
 0x2e2   :  { %v334_v45 = vsel %vm333_vm3, %v327_v42, %v331_v43 }
 0x2e3   :  { %v335_v47 = vpack.c.bf16 %v334_v45, %v334_v45 }
 0x2e5   :  { %1219 = vmatmul.mubr.msk.bf16.vlgmr.msra.gmra.mrb[4].mxu1 %vm226_vm4, %v335_v47 }
 0x2e6   :  { %556 = vmatpush1.bf16.msra.mxu1 %v1513_v4  ;;  %587 = vmatprep.mubr.bf16.mxu1 %v1450_v2 }
 0x2e7   :  { %557 = vmatprep.subr.bf16.mxu1 %v1524_v6 }
 0x2ea   :  { %558 = vmatpush1.bf16.msra.mxu1 %v1529_v7 }
 0x2eb   :  { %559 = vmatprep.subr.bf16.mxu1 %v1534_v8 }
 0x2ee   :  { %560 = vmatpush1.bf16.msra.mxu1 %v1543_v9 }
 0x2ef   :  { %561 = vmatprep.subr.bf16.mxu1 %v1550_v10 }
 0x2f2   :  { %562 = vmatpush1.bf16.msra.mxu1 %v1559_v12 }
 0x2f3   :  { %771 = vmatprep.subr.bf16.mxu1 %v1503_v1 }
 0x3b8   :  { %v373_v49 = vpop.f32.mrb[4].mxu1 }
 0x3b9   :  { %v380_v51 = vadd.f32 %v373_v49, %v1599_v26  ;;  %v375_v52 = vpop.f32.mrb[5].mxu1 }
 0x3ba   :  { %v381_v54 = vadd.f32 %v375_v52, %v1621_v55  ;;  %v377_v56 = vpop.f32.mrb[6].mxu1 }
 0x3bb   :  { %1310 = vtanh.f32 %v380_v51  ;;  %v378_v58 = vpop.f32.mrb[7].mxu1  ;;  %v1220_v61 = vmul.f32 -1.442695, %v380_v51 }
 0x3bc   :  { %1312 = vtanh.f32 %v381_v54  ;;  %v1221_v62 = vmul.f32 -1.442695, %v381_v54 }
 0x3bd   :  { %1314 = vpow2.f32 %v1220_v61 }
 0x3be   :  { %1316 = vpow2.f32 %v1221_v62 }
 0x3c5   :  { %v1311_v59 = vpop.eup %1310 }
 0x3c6   :  { %v1313_v60 = vpop.eup %1312  ;;  %398 = vrot.lane.b32.xlu0 %v1311_v59, %s1451_s0 }
 0x3c7   :  { %409 = vrot.lane.b32.xlu1 %v1313_v60, %s1451_s0  ;;  %v1315_v63 = vpop.eup %1314 }
 0x3c8   :  { %v1317_v0 = vpop.eup %1316  ;;  %v385_v26 = vadd.f32 1.0, %v1315_v63 }
 0x3c9   :  { %v391_v3 = vadd.f32 1.0, %v1317_v0 }
 0x3ca   :  { %1318 = vrcp.f32 %v385_v26 }
 0x3cb   :  { %1320 = vrcp.f32 %v391_v3 }
 0x3d4   :  { %v1319_v55 = vpop.eup %1318 }
 0x3d5   :  { %v1321_v11 = vpop.eup %1320  ;;  %v396_v18 = vmul.f32 %v1319_v55, %v1676_v16 }
 0x3d6   :  { %v407_v20 = vmul.f32 %v1321_v11, %v1681_v17 }
 0x438   :  { %v399_v5 = vpop.permute.xlu0 %398 }
 0x439   :  { %v401_v13 = vmul.f32 %v1319_v55, %v399_v5  ;;  %v410_v14 = vpop.permute.xlu1 %409 }
 0x43a   :  { %v412_v15 = vmul.f32 %v1321_v11, %v410_v14 }
 0x43b   :  { %403 = vrot.lane.b32.xlu0 %v401_v13, %s1451_s0 }
 0x43c   :  { %414 = vrot.lane.b32.xlu1 %v412_v15, %s1451_s0 }
 0x4ad   :  { %v404_v19 = vpop.permute.xlu0 %403 }
 0x4ae   :  { %v1685_v21 = vadd.f32 %v404_v19, %v396_v18  ;;  %v415_v23 = vpop.permute.xlu1 %414 }
 0x4af   :  { %v1687_v25 = vadd.f32 %v415_v23, %v407_v20 }
 0x4b0   :  { %1322 = vtanh.f32 %v1685_v21 }
 0x4b1   :  { %1324 = vtanh.f32 %v1687_v25  ;;  %v1737_v14 = vsel %vm184_vm6, %v1687_v25, %v1681_v17 }
 0x4ba   :  { %v1323_v22 = vpop.eup %1322 }
 0x4bb   :  { %v1325_v27 = vpop.eup %1324  ;;  %420 = vrot.lane.b32.xlu0 %v1323_v22, %s1451_s0 }
 0x4bc   :  { %426 = vrot.lane.b32.xlu1 %v1325_v27, %s1451_s0 }
 0x52d   :  { %v421_v29 = vpop.permute.xlu0 %420 }
 0x52e   :  { %v423_v31 = vmul.f32 %v1319_v55, %v421_v29  ;;  %v427_v34 = vpop.permute.xlu1 %426 }
 0x52f   :  { %v429_v36 = vmul.f32 %v1321_v11, %v427_v34  ;;  %v1730_v11 = vsel %vm179_vm5, %v1685_v21, %v1676_v16 }
 0x530   :  { %v1697_v39 = vsel %vm179_vm5, %v423_v31, %v1645_v38 }
 0x531   :  { %435 = vrot.lane.b32.xlu0 %v1697_v39, %s1452_s1  ;;  %v1705_v40 = vsel %vm184_vm6, %v429_v36, %v1652_v41 }
 0x532   :  { %439 = vrot.lane.b32.xlu1 %v1705_v40, %s1453_s30 }
 0x5a3   :  { %v436_v42 = vpop.permute.xlu0 %435 }
 0x5a4   :  { %v440_v43 = vpop.permute.xlu1 %439 }
 0x5a5   :  { %v442_v45 = vsel %vm333_vm3, %v436_v42, %v440_v43 }
 0x5a6   :  { %v443_v47 = vpack.c.bf16 %v442_v45, %v442_v45 }
 0x5a8   :  { %1222 = vmatmul.mubr.msk.bf16.vlgmr.msra.gmra.mrb[16].mxu0 %vm226_vm4, %v443_v47 }
 0x5a9   :  { %664 = vmatpush1.bf16.msra.mxu0 %v1513_v4  ;;  %695 = vmatprep.mubr.bf16.mxu0 %v1450_v2 }
 0x5aa   :  { %665 = vmatprep.subr.bf16.mxu0 %v1524_v6 }
 0x5ad   :  { %666 = vmatpush1.bf16.msra.mxu0 %v1529_v7 }
 0x5ae   :  { %667 = vmatprep.subr.bf16.mxu0 %v1534_v8 }
 0x5b1   :  { %668 = vmatpush1.bf16.msra.mxu0 %v1543_v9 }
 0x5b2   :  { %669 = vmatprep.subr.bf16.mxu0 %v1550_v10 }
 0x5b5   :  { %670 = vmatpush1.bf16.msra.mxu0 %v1559_v12 }
 0x5b6   :  { %879 = vmatprep.subr.bf16.mxu0 %v1503_v1 }
 0x67b   :  { %v481_v38 = vpop.f32.mrb[16].mxu0 }
 0x67c   :  { %v488_v41 = vadd.f32 %v481_v38, %v1603_v30  ;;  %v483_v49 = vpop.f32.mrb[17].mxu0 }
 0x67d   :  { %v489_v51 = vadd.f32 %v483_v49, %v1617_v50  ;;  %v485_v52 = vpop.f32.mrb[18].mxu0 }
 0x67e   :  { %1326 = vtanh.f32 %v488_v41  ;;  %v486_v54 = vpop.f32.mrb[19].mxu0  ;;  %v1223_v59 = vmul.f32 -1.442695, %v488_v41 }
 0x67f   :  { %1328 = vtanh.f32 %v489_v51  ;;  %v1224_v60 = vmul.f32 -1.442695, %v489_v51 }
 0x680   :  { %1330 = vpow2.f32 %v1223_v59 }
 0x681   :  { %1332 = vpow2.f32 %v1224_v60 }
 0x688   :  { %v1327_v56 = vpop.eup %1326 }
 0x689   :  { %v1329_v58 = vpop.eup %1328  ;;  %506 = vrot.lane.b32.xlu0 %v1327_v56, %s1451_s0 }
 0x68a   :  { %517 = vrot.lane.b32.xlu1 %v1329_v58, %s1451_s0  ;;  %v1331_v61 = vpop.eup %1330 }
 0x68b   :  { %v1333_v62 = vpop.eup %1332  ;;  %v493_v30 = vadd.f32 1.0, %v1331_v61 }
 0x68c   :  { %v499_v63 = vadd.f32 1.0, %v1333_v62 }
 0x68d   :  { %1334 = vrcp.f32 %v493_v30 }
 0x68e   :  { %1336 = vrcp.f32 %v499_v63 }
 0x697   :  { %v1335_v50 = vpop.eup %1334 }
 0x698   :  { %v1337_v26 = vpop.eup %1336  ;;  %v504_v13 = vmul.f32 %v1335_v50, %v1730_v11 }
 0x699   :  { %v515_v18 = vmul.f32 %v1337_v26, %v1737_v14 }
 0x6fb   :  { %v507_v0 = vpop.permute.xlu0 %506 }
 0x6fc   :  { %v509_v3 = vmul.f32 %v1335_v50, %v507_v0  ;;  %v518_v55 = vpop.permute.xlu1 %517 }
 0x6fd   :  { %v520_v5 = vmul.f32 %v1337_v26, %v518_v55 }
 0x6fe   :  { %511 = vrot.lane.b32.xlu0 %v509_v3, %s1451_s0 }
 0x6ff   :  { %522 = vrot.lane.b32.xlu1 %v520_v5, %s1451_s0 }
 0x770   :  { %v512_v15 = vpop.permute.xlu0 %511 }
 0x771   :  { %v1740_v19 = vadd.f32 %v512_v15, %v504_v13  ;;  %v523_v20 = vpop.permute.xlu1 %522 }
 0x772   :  { %v1742_v23 = vadd.f32 %v523_v20, %v515_v18 }
 0x773   :  { %1338 = vtanh.f32 %v1740_v19  ;;  %v1785_v63 = vsel %vm180_vm7, %v1740_v19, %v1730_v11 }
 0x774   :  { %1340 = vtanh.f32 %v1742_v23  ;;  %v1792_v0 = vsel %vm183_vm8, %v1742_v23, %v1737_v14 }
 0x77d   :  { %v1339_v16 = vpop.eup %1338 }
 0x77e   :  { %v1341_v21 = vpop.eup %1340  ;;  %528 = vrot.lane.b32.xlu0 %v1339_v16, %s1451_s0 }
 0x77f   :  { %534 = vrot.lane.b32.xlu1 %v1341_v21, %s1451_s0 }
 0x7f0   :  { %v529_v17 = vpop.permute.xlu0 %528 }
 0x7f1   :  { %v531_v25 = vmul.f32 %v1335_v50, %v529_v17  ;;  %v535_v22 = vpop.permute.xlu1 %534 }
 0x7f2   :  { %v537_v27 = vmul.f32 %v1337_v26, %v535_v22 }
 0x7f3   :  { %v1752_v29 = vsel %vm180_vm7, %v531_v25, %v1697_v39 }
 0x7f4   :  { %543 = vrot.lane.b32.xlu0 %v1752_v29, %s1452_s1  ;;  %v1760_v31 = vsel %vm183_vm8, %v537_v27, %v1705_v40 }
 0x7f5   :  { %547 = vrot.lane.b32.xlu1 %v1760_v31, %s1453_s30 }
 0x866   :  { %v544_v34 = vpop.permute.xlu0 %543 }
 0x867   :  { %v548_v36 = vpop.permute.xlu1 %547 }
 0x868   :  { %v550_v42 = vsel %vm333_vm3, %v544_v34, %v548_v36 }
 0x869   :  { %v551_v43 = vpack.c.bf16 %v550_v42, %v550_v42 }
 0x86b   :  { %1225 = vmatmul.mubr.msk.bf16.vlgmr.msra.gmra.mrb[8].mxu1 %vm226_vm4, %v551_v43 }
 0x86c   :  { %772 = vmatpush1.bf16.msra.mxu1 %v1513_v4  ;;  %803 = vmatprep.mubr.bf16.mxu1 %v1450_v2 }
 0x86d   :  { %773 = vmatprep.subr.bf16.mxu1 %v1524_v6 }
 0x870   :  { %774 = vmatpush1.bf16.msra.mxu1 %v1529_v7 }
 0x871   :  { %775 = vmatprep.subr.bf16.mxu1 %v1534_v8 }
 0x874   :  { %776 = vmatpush1.bf16.msra.mxu1 %v1543_v9 }
 0x875   :  { %777 = vmatprep.subr.bf16.mxu1 %v1550_v10 }
 0x878   :  { %778 = vmatpush1.bf16.msra.mxu1 %v1559_v12 }
 0x879   :  { %987 = vmatprep.subr.bf16.mxu1 %v1503_v1 }
 0x93e   :  { %v589_v39 = vpop.f32.mrb[8].mxu1 }
 0x93f   :  { %v596_v40 = vadd.f32 %v589_v39, %v1607_v35  ;;  %v591_v45 = vpop.f32.mrb[9].mxu1 }
 0x940   :  { %v597_v47 = vadd.f32 %v591_v45, %v1613_v46  ;;  %v593_v38 = vpop.f32.mrb[10].mxu1 }
 0x941   :  { %1342 = vtanh.f32 %v596_v40  ;;  %v594_v41 = vpop.f32.mrb[11].mxu1  ;;  %v1226_v52 = vmul.f32 -1.442695, %v596_v40 }
 0x942   :  { %1344 = vtanh.f32 %v597_v47  ;;  %v1227_v54 = vmul.f32 -1.442695, %v597_v47 }
 0x943   :  { %1346 = vpow2.f32 %v1226_v52 }
 0x944   :  { %1348 = vpow2.f32 %v1227_v54 }
 0x94b   :  { %v1343_v49 = vpop.eup %1342 }
 0x94c   :  { %v1345_v51 = vpop.eup %1344  ;;  %614 = vrot.lane.b32.xlu0 %v1343_v49, %s1451_s0 }
 0x94d   :  { %625 = vrot.lane.b32.xlu1 %v1345_v51, %s1451_s0  ;;  %v1347_v1 = vpop.eup %1346 }
 0x94e   :  { %v1349_v56 = vpop.eup %1348  ;;  %v601_v35 = vadd.f32 1.0, %v1347_v1 }
 0x94f   :  { %v607_v58 = vadd.f32 1.0, %v1349_v56 }
 0x950   :  { %1350 = vrcp.f32 %v601_v35 }
 0x951   :  { %1352 = vrcp.f32 %v607_v58 }
 0x95a   :  { %v1351_v46 = vpop.eup %1350 }
 0x95b   :  { %v1353_v60 = vpop.eup %1352  ;;  %v612_v50 = vmul.f32 %v1351_v46, %v1785_v63 }
 0x95c   :  { %v623_v3 = vmul.f32 %v1353_v60, %v1792_v0 }
 0x9be   :  { %v615_v59 = vpop.permute.xlu0 %614 }
 0x9bf   :  { %v617_v61 = vmul.f32 %v1351_v46, %v615_v59  ;;  %v626_v62 = vpop.permute.xlu1 %625 }
 0x9c0   :  { %v628_v30 = vmul.f32 %v1353_v60, %v626_v62 }
 0x9c1   :  { %619 = vrot.lane.b32.xlu0 %v617_v61, %s1451_s0 }
 0x9c2   :  { %630 = vrot.lane.b32.xlu1 %v628_v30, %s1451_s0 }
 0xa33   :  { %v620_v26 = vpop.permute.xlu0 %619 }
 0xa34   :  { %v1795_v55 = vadd.f32 %v620_v26, %v612_v50  ;;  %v631_v5 = vpop.permute.xlu1 %630 }
 0xa35   :  { %v1797_v13 = vadd.f32 %v631_v5, %v623_v3 }
 0xa36   :  { %1354 = vtanh.f32 %v1795_v55  ;;  %v1839_v56 = vsel %vm181_vm9, %v1795_v55, %v1785_v63 }
 0xa37   :  { %1356 = vtanh.f32 %v1797_v13  ;;  %v1846_v58 = vsel %vm182_vm10, %v1797_v13, %v1792_v0 }
 0xa40   :  { %v1355_v11 = vpop.eup %1354 }
 0xa41   :  { %v1357_v15 = vpop.eup %1356  ;;  %636 = vrot.lane.b32.xlu0 %v1355_v11, %s1451_s0 }
 0xa42   :  { %642 = vrot.lane.b32.xlu1 %v1357_v15, %s1451_s0 }
 0xab3   :  { %v637_v14 = vpop.permute.xlu0 %636 }
 0xab4   :  { %v639_v18 = vmul.f32 %v1351_v46, %v637_v14  ;;  %v643_v19 = vpop.permute.xlu1 %642 }
 0xab5   :  { %v645_v20 = vmul.f32 %v1353_v60, %v643_v19 }
 0xab6   :  { %v1807_v23 = vsel %vm181_vm9, %v639_v18, %v1752_v29 }
 0xab7   :  { %651 = vrot.lane.b32.xlu0 %v1807_v23, %s1452_s1  ;;  %v1815_v16 = vsel %vm182_vm10, %v645_v20, %v1760_v31 }
 0xab8   :  { %655 = vrot.lane.b32.xlu1 %v1815_v16, %s1453_s30 }
 0xb29   :  { %v652_v21 = vpop.permute.xlu0 %651 }
 0xb2a   :  { %v656_v17 = vpop.permute.xlu1 %655 }
 0xb2b   :  { %v658_v25 = vsel %vm333_vm3, %v652_v21, %v656_v17 }
 0xb2c   :  { %v659_v22 = vpack.c.bf16 %v658_v25, %v658_v25 }
 0xb2e   :  { %1228 = vmatmul.mubr.msk.bf16.vlgmr.msra.gmra.mrb[20].mxu0 %vm226_vm4, %v659_v22 }
 0xb2f   :  { %880 = vmatpush1.bf16.msra.mxu0 %v1513_v4  ;;  %911 = vmatprep.mubr.bf16.mxu0 %v1450_v2 }
 0xb30   :  { %881 = vmatprep.subr.bf16.mxu0 %v1524_v6 }
 0xb33   :  { %882 = vmatpush1.bf16.msra.mxu0 %v1529_v7 }
 0xb34   :  { %883 = vmatprep.subr.bf16.mxu0 %v1534_v8 }
 0xb37   :  { %884 = vmatpush1.bf16.msra.mxu0 %v1543_v9 }
 0xb38   :  { %885 = vmatprep.subr.bf16.mxu0 %v1550_v10 }
 0xb3b   :  { %886 = vmatpush1.bf16.msra.mxu0 %v1559_v12 }
 0xc01   :  { %v697_v27 = vpop.f32.mrb[20].mxu0 }
 0xc02   :  { %v704_v29 = vadd.f32 %v697_v27, %v1611_v44  ;;  %v699_v31 = vpop.f32.mrb[21].mxu0 }
 0xc03   :  { %v705_v34 = vadd.f32 %v699_v31, %v1609_v37  ;;  %v701_v36 = vpop.f32.mrb[22].mxu0 }
 0xc04   :  { %1358 = vtanh.f32 %v704_v29  ;;  %v702_v42 = vpop.f32.mrb[23].mxu0  ;;  %v1229_v40 = vmul.f32 -1.442695, %v704_v29 }
 0xc05   :  { %1360 = vtanh.f32 %v705_v34  ;;  %v1230_v45 = vmul.f32 -1.442695, %v705_v34 }
 0xc06   :  { %1362 = vpow2.f32 %v1229_v40 }
 0xc07   :  { %1364 = vpow2.f32 %v1230_v45 }
 0xc0e   :  { %v1359_v43 = vpop.eup %1358 }
 0xc0f   :  { %v1361_v39 = vpop.eup %1360  ;;  %722 = vrot.lane.b32.xlu0 %v1359_v43, %s1451_s0 }
 0xc10   :  { %733 = vrot.lane.b32.xlu1 %v1361_v39, %s1451_s0  ;;  %v1363_v47 = vpop.eup %1362 }
 0xc11   :  { %v1365_v38 = vpop.eup %1364  ;;  %v709_v44 = vadd.f32 1.0, %v1363_v47 }
 0xc12   :  { %v715_v41 = vadd.f32 1.0, %v1365_v38 }
 0xc13   :  { %1366 = vrcp.f32 %v709_v44 }
 0xc14   :  { %1368 = vrcp.f32 %v715_v41 }
 0xc1d   :  { %v1367_v37 = vpop.eup %1366 }
 0xc1e   :  { %v1369_v51 = vpop.eup %1368  ;;  %v720_v35 = vmul.f32 %v1367_v37, %v1839_v56 }
 0xc1f   :  { %v731_v59 = vmul.f32 %v1369_v51, %v1846_v58 }
 0xc81   :  { %v723_v49 = vpop.permute.xlu0 %722 }
 0xc82   :  { %v725_v52 = vmul.f32 %v1367_v37, %v723_v49  ;;  %v734_v54 = vpop.permute.xlu1 %733 }
 0xc83   :  { %v736_v1 = vmul.f32 %v1369_v51, %v734_v54 }
 0xc84   :  { %727 = vrot.lane.b32.xlu0 %v725_v52, %s1451_s0 }
 0xc85   :  { %738 = vrot.lane.b32.xlu1 %v736_v1, %s1451_s0 }
 0xcf6   :  { %v728_v46 = vpop.permute.xlu0 %727 }
 0xcf7   :  { %v730_v60 = vadd.f32 %v728_v46, %v720_v35  ;;  %v739_v61 = vpop.permute.xlu1 %738 }
 0xcf8   :  { %v741_v62 = vadd.f32 %v739_v61, %v731_v59 }
 0xcf9   :  { %1370 = vtanh.f32 %v730_v60  ;;  %v754_v29 = vsel %vm182_vm10, %v730_v60, %v1839_v56 }
 0xcfa   :  { %1372 = vtanh.f32 %v741_v62  ;;  %v755_v34 = vsel %vm181_vm9, %v741_v62, %v1846_v58 }
 0xd03   :  { %v1371_v30 = vpop.eup %1370 }
 0xd04   :  { %v1373_v50 = vpop.eup %1372  ;;  %744 = vrot.lane.b32.xlu0 %v1371_v30, %s1451_s0 }
 0xd05   :  { %750 = vrot.lane.b32.xlu1 %v1373_v50, %s1451_s0 }
 0xd76   :  { %v745_v63 = vpop.permute.xlu0 %744 }
 0xd77   :  { %v747_v26 = vmul.f32 %v1367_v37, %v745_v63  ;;  %v751_v3 = vpop.permute.xlu1 %750 }
 0xd78   :  { %v753_v55 = vmul.f32 %v1369_v51, %v751_v3 }
 0xd79   :  { %v1854_v0 = vsel %vm182_vm10, %v747_v26, %v1807_v23 }
 0xd7a   :  { %759 = vrot.lane.b32.xlu0 %v1854_v0, %s1452_s1  ;;  %v1861_v5 = vsel %vm181_vm9, %v753_v55, %v1815_v16 }
 0xd7b   :  { %763 = vrot.lane.b32.xlu1 %v1861_v5, %s1453_s30 }
 0xdec   :  { %v760_v13 = vpop.permute.xlu0 %759 }
 0xded   :  { %v764_v11 = vpop.permute.xlu1 %763 }
 0xdee   :  { %v766_v15 = vsel %vm333_vm3, %v760_v13, %v764_v11 }
 0xdef   :  { %v767_v14 = vpack.c.bf16 %v766_v15, %v766_v15 }
 0xdf1   :  { %1231 = vmatmul.mubr.msk.bf16.vlgmr.msra.gmra.mrb[12].mxu1 %vm226_vm4, %v767_v14 }
 0xdf2   :  { %988 = vmatpush1.bf16.msra.mxu1 %v1513_v4  ;;  %1019 = vmatprep.mubr.bf16.mxu1 %v1450_v2 }
 0xdf3   :  { %989 = vmatprep.subr.bf16.mxu1 %v1524_v6 }
 0xdf6   :  { %990 = vmatpush1.bf16.msra.mxu1 %v1529_v7 }
 0xdf7   :  { %991 = vmatprep.subr.bf16.mxu1 %v1534_v8 }
 0xdfa   :  { %992 = vmatpush1.bf16.msra.mxu1 %v1543_v9 }
 0xdfb   :  { %993 = vmatprep.subr.bf16.mxu1 %v1550_v10 }
 0xdfe   :  { %994 = vmatpush1.bf16.msra.mxu1 %v1559_v12 }
 0xec4   :  { %v805_v18 = vpop.f32.mrb[12].mxu1 }
 0xec5   :  { %v812_v19 = vadd.f32 %v805_v18, %v1615_v48  ;;  %v807_v20 = vpop.f32.mrb[13].mxu1 }
 0xec6   :  { %v813_v4 = vadd.f32 %v807_v20, %v1605_v32  ;;  %v809_v23 = vpop.f32.mrb[14].mxu1 }
 0xec7   :  { %1374 = vtanh.f32 %v812_v19  ;;  %v810_v2 = vpop.f32.mrb[15].mxu1  ;;  %v1232_v8 = vmul.f32 -1.442695, %v812_v19 }
 0xec8   :  { %1376 = vtanh.f32 %v813_v4  ;;  %v1233_v9 = vmul.f32 -1.442695, %v813_v4 }
 0xec9   :  { %1378 = vpow2.f32 %v1232_v8 }
 0xeca   :  { %1380 = vpow2.f32 %v1233_v9 }
 0xed1   :  { %v1375_v6 = vpop.eup %1374 }
 0xed2   :  { %v1377_v7 = vpop.eup %1376  ;;  %830 = vrot.lane.b32.xlu0 %v1375_v6, %s1451_s0 }
 0xed3   :  { %841 = vrot.lane.b32.xlu1 %v1377_v7, %s1451_s0  ;;  %v1379_v10 = vpop.eup %1378 }
 0xed4   :  { %v1381_v12 = vpop.eup %1380  ;;  %v817_v48 = vadd.f32 1.0, %v1379_v10 }
 0xed5   :  { %v823_v16 = vadd.f32 1.0, %v1381_v12 }
 0xed6   :  { %1382 = vrcp.f32 %v817_v48 }
 0xed7   :  { %1384 = vrcp.f32 %v823_v16 }
 0xee0   :  { %v1383_v32 = vpop.eup %1382 }
 0xee1   :  { %v1385_v17 = vpop.eup %1384  ;;  %v828_v31 = vmul.f32 %v1383_v32, %v754_v29 }
 0xee2   :  { %v839_v42 = vmul.f32 %v1385_v17, %v755_v34 }
 0xf44   :  { %v831_v21 = vpop.permute.xlu0 %830 }
 0xf45   :  { %v833_v25 = vmul.f32 %v1383_v32, %v831_v21  ;;  %v842_v22 = vpop.permute.xlu1 %841 }
 0xf46   :  { %v844_v27 = vmul.f32 %v1385_v17, %v842_v22 }
 0xf47   :  { %835 = vrot.lane.b32.xlu0 %v833_v25, %s1451_s0 }
 0xf48   :  { %846 = vrot.lane.b32.xlu1 %v844_v27, %s1451_s0 }
 0xfb9   :  { %v836_v36 = vpop.permute.xlu0 %835 }
 0xfba   :  { %v838_v43 = vadd.f32 %v836_v36, %v828_v31  ;;  %v847_v39 = vpop.permute.xlu1 %846 }
 0xfbb   :  { %v849_v40 = vadd.f32 %v847_v39, %v839_v42 }
 0xfbc   :  { %1386 = vtanh.f32 %v838_v43  ;;  %v862_v14 = vsel %vm183_vm8, %v838_v43, %v754_v29 }
 0xfbd   :  { %1388 = vtanh.f32 %v849_v40  ;;  %v863_v19 = vsel %vm180_vm7, %v849_v40, %v755_v34 }
 0xfc6   :  { %v1387_v45 = vpop.eup %1386 }
 0xfc7   :  { %v1389_v47 = vpop.eup %1388  ;;  %852 = vrot.lane.b32.xlu0 %v1387_v45, %s1451_s0 }
 0xfc8   :  { %858 = vrot.lane.b32.xlu1 %v1389_v47, %s1451_s0 }
0x1039   :  { %v853_v38 = vpop.permute.xlu0 %852 }
0x103a   :  { %v855_v44 = vmul.f32 %v1383_v32, %v853_v38  ;;  %v859_v41 = vpop.permute.xlu1 %858 }
0x103b   :  { %v861_v37 = vmul.f32 %v1385_v17, %v859_v41 }
0x103c   :  { %v864_v49 = vsel %vm183_vm8, %v855_v44, %v1854_v0 }
0x103d   :  { %867 = vrot.lane.b32.xlu0 %v864_v49, %s1452_s1  ;;  %v865_v51 = vsel %vm180_vm7, %v861_v37, %v1861_v5 }
0x103e   :  { %871 = vrot.lane.b32.xlu1 %v865_v51, %s1453_s30 }
0x10af   :  { %v868_v52 = vpop.permute.xlu0 %867 }
0x10b0   :  { %v872_v54 = vpop.permute.xlu1 %871 }
0x10b1   :  { %v874_v1 = vsel %vm333_vm3, %v868_v52, %v872_v54 }
0x10b2   :  { %v875_v56 = vpack.c.bf16 %v874_v1, %v874_v1 }
0x10b4   :  { %1234 = vmatmul.mubr.msk.bf16.vlgmr.msra.gmra.mrb[24].mxu0 %vm226_vm4, %v875_v56 }
0x1187   :  { %v913_v35 = vpop.f32.mrb[24].mxu0 }
0x1188   :  { %v920_v58 = vadd.f32 %v913_v35, %v1619_v53  ;;  %v915_v46 = vpop.f32.mrb[25].mxu0 }
0x1189   :  { %v921_v59 = vadd.f32 %v915_v46, %v1601_v28  ;;  %v917_v60 = vpop.f32.mrb[26].mxu0 }
0x118a   :  { %1390 = vtanh.f32 %v920_v58  ;;  %v918_v61 = vpop.f32.mrb[27].mxu0  ;;  %v1235_v50 = vmul.f32 -1.442695, %v920_v58 }
0x118b   :  { %1392 = vtanh.f32 %v921_v59  ;;  %v1236_v63 = vmul.f32 -1.442695, %v921_v59  ;;  %v1290_v61 = vld [vmem:[%s1982_s5] sm:$0xff]  }
0x118c   :  { %1394 = vpow2.f32 %v1235_v50  ;;  %v1292_v50 = vld [vmem:[%s1982_s5 + $0x10] sm:$0xff]  }
0x118d   :  { %1396 = vpow2.f32 %v1236_v63 }
0x1194   :  { %v1391_v62 = vpop.eup %1390 }
0x1195   :  { %v1393_v30 = vpop.eup %1392  ;;  %938 = vrot.lane.b32.xlu0 %v1391_v62, %s1451_s0  ;;  %v1454_v62 = vmov 0.0  }
0x1196   :  { %949 = vrot.lane.b32.xlu1 %v1393_v30, %s1451_s0  ;;  %v1395_v26 = vpop.eup %1394  ;;  %1251 = vmatprep.subr.bf16.mxu0 %v1454_v62  ;;  %v1291_v30 = vld [vmem:[%s1982_s5 + $0x8] sm:$0xff]  }
0x1197   :  { %v1397_v3 = vpop.eup %1396  ;;  %v925_v53 = vadd.f32 1.0, %v1395_v26  ;;  %1252 = vmatpush3.bf16.msra.mxu0 %v1290_v61  ;;  %1259 = vmatprep.mubr.msk.bf16.mxu0 %vm1455_vm11, %v1454_v62 }
0x1198   :  { %v931_v55 = vadd.f32 1.0, %v1397_v3  ;;  %1253 = vmatprep.subr.bf16.mxu0 %v1454_v62  ;;  %v1293_v3 = vld [vmem:[%s1982_s5 + $0x18] sm:$0xff]  }
0x1199   :  { %1398 = vrcp.f32 %v925_v53 }
0x119a   :  { %1400 = vrcp.f32 %v931_v55 }
0x119b   :  { %1254 = vmatpush3.bf16.msra.mxu0 %v1291_v30 }
0x119c   :  { %1255 = vmatprep.subr.bf16.mxu0 %v1454_v62 }
0x119f   :  { %1256 = vmatpush3.bf16.msra.mxu0 %v1292_v50 }
0x11a0   :  { %1257 = vmatprep.subr.bf16.mxu0 %v1454_v62 }
0x11a3   :  { %v1399_v28 = vpop.eup %1398  ;;  %1258 = vmatpush3.bf16.msra.mxu0 %v1293_v3 }
0x11a4   :  { %v1401_v5 = vpop.eup %1400  ;;  %v936_v18 = vmul.f32 %v1399_v28, %v862_v14 }
0x11a5   :  { %v947_v4 = vmul.f32 %v1401_v5, %v863_v19 }
0x1207   :  { %v939_v0 = vpop.permute.xlu0 %938 }
0x1208   :  { %v941_v13 = vmul.f32 %v1399_v28, %v939_v0  ;;  %v950_v11 = vpop.permute.xlu1 %949 }
0x1209   :  { %v952_v15 = vmul.f32 %v1401_v5, %v950_v11 }
0x120a   :  { %943 = vrot.lane.b32.xlu0 %v941_v13, %s1451_s0 }
0x120b   :  { %954 = vrot.lane.b32.xlu1 %v952_v15, %s1451_s0 }
0x127c   :  { %v944_v20 = vpop.permute.xlu0 %943 }
0x127d   :  { %v946_v23 = vadd.f32 %v944_v20, %v936_v18  ;;  %v955_v2 = vpop.permute.xlu1 %954 }
0x127e   :  { %v957_v6 = vadd.f32 %v955_v2, %v947_v4 }
0x127f   :  { %1402 = vtanh.f32 %v946_v23  ;;  %v970_v54 = vsel %vm184_vm6, %v946_v23, %v862_v14 }
0x1280   :  { %1404 = vtanh.f32 %v957_v6  ;;  %v971_v56 = vsel %vm179_vm5, %v957_v6, %v863_v19  ;;  %v1240_v19 = vld [vmem:[%s1983_s6] ss:$0 sm:$0xff]  ;;  %s1456_s6 = smov [#allocation2]  }
0x1281   :  { %s1191_s16 = sshll.u32 %s1456_s6, 4  ;;  %s1192_s16 = int_to_ptr.vmem [resolvable:$true] %s1191_s16 }
0x1282   :  { %s1426_s17 = scalar_lea.vmem %s1192_s16, 128  ;;  %p1431_p1 = scmp.lt.s32.totalorder %s1192_s16, %s1192_s16 }
0x1283   :  { %p1427_p0 = scmp.ne.s32.totalorder %s1192_s16, %s1426_s17  ;;  %p1432_p2 = scmp.lt.s32.totalorder %s1426_s17, %s1426_s17 }
0x1285   :  { %p1433_p3 = por %p1432_p2, %p1431_p1 }
0x1287   :  { %p1434_p4 = pnand %p1433_p3, %p1427_p0 }
0x1289   :  { %v1403_v7 = vpop.eup %1402 }
0x128a   :  { %v1405_v8 = vpop.eup %1404  ;;  %960 = vrot.lane.b32.xlu0 %v1403_v7, %s1451_s0 }
0x128b   :  { %966 = vrot.lane.b32.xlu1 %v1405_v8, %s1451_s0 }
0x12fc   :  { %v961_v9 = vpop.permute.xlu0 %960 }
0x12fd   :  { %v963_v10 = vmul.f32 %v1399_v28, %v961_v9  ;;  %v967_v12 = vpop.permute.xlu1 %966 }
0x12fe   :  { %v969_v48 = vmul.f32 %v1401_v5, %v967_v12 }
0x12ff   :  { %v1913_v16 = vsel %vm184_vm6, %v963_v10, %v864_v49 }
0x1300   :  { %975 = vrot.lane.b32.xlu0 %v1913_v16, %s1452_s1  ;;  %v1919_v32 = vsel %vm179_vm5, %v969_v48, %v865_v51 }
0x1301   :  { %979 = vrot.lane.b32.xlu1 %v1919_v32, %s1453_s30 }
0x1372   :  { %v976_v21 = vpop.permute.xlu0 %975 }
0x1373   :  { %v980_v17 = vpop.permute.xlu1 %979 }
0x1374   :  { %v982_v25 = vsel %vm333_vm3, %v976_v21, %v980_v17 }
0x1375   :  { %v983_v22 = vpack.c.bf16 %v982_v25, %v982_v25 }
0x1377   :  { %1237 = vmatmul.mubr.msk.bf16.vlgmr.msra.gmra.mrb[16].mxu1 %vm226_vm4, %v983_v22 }
0x144a   :  { %v1021_v27 = vpop.f32.mrb[16].mxu1 }
0x144b   :  { %v1028_v29 = vadd.f32 %v1021_v27, %v1624_v57  ;;  %v1023_v31 = vpop.f32.mrb[17].mxu1 }
0x144c   :  { %v1029_v34 = vadd.f32 %v1023_v31, %v1597_v24  ;;  %v1025_v36 = vpop.f32.mrb[18].mxu1 }
0x144d   :  { %1406 = vtanh.f32 %v1028_v29  ;;  %v1026_v42 = vpop.f32.mrb[19].mxu1  ;;  %v1238_v40 = vmul.f32 -1.442695, %v1028_v29 }
0x144e   :  { %1408 = vtanh.f32 %v1029_v34  ;;  %v1239_v45 = vmul.f32 -1.442695, %v1029_v34 }
0x144f   :  { %1410 = vpow2.f32 %v1238_v40 }
0x1450   :  { %1412 = vpow2.f32 %v1239_v45 }
0x1457   :  { %v1407_v43 = vpop.eup %1406 }
0x1458   :  { %v1409_v39 = vpop.eup %1408  ;;  %1046 = vrot.lane.b32.xlu0 %v1407_v43, %s1451_s0 }
0x1459   :  { %1057 = vrot.lane.b32.xlu1 %v1409_v39, %s1451_s0  ;;  %v1411_v47 = vpop.eup %1410 }
0x145a   :  { %v1413_v38 = vpop.eup %1412  ;;  %v1033_v57 = vadd.f32 1.0, %v1411_v47 }
0x145b   :  { %v1039_v44 = vadd.f32 1.0, %v1413_v38 }
0x145c   :  { %1414 = vrcp.f32 %v1033_v57 }
0x145d   :  { %1416 = vrcp.f32 %v1039_v44 }
0x1466   :  { %v1415_v24 = vpop.eup %1414 }
0x1467   :  { %v1417_v37 = vpop.eup %1416  ;;  %v1044_v1 = vmul.f32 %v1415_v24, %v970_v54 }
0x1468   :  { %v1055_v58 = vmul.f32 %v1417_v37, %v971_v56 }
0x14ca   :  { %v1047_v41 = vpop.permute.xlu0 %1046 }
0x14cb   :  { %v1049_v49 = vmul.f32 %v1415_v24, %v1047_v41  ;;  %v1058_v51 = vpop.permute.xlu1 %1057 }
0x14cc   :  { %v1060_v52 = vmul.f32 %v1417_v37, %v1058_v51 }
0x14cd   :  { %1051 = vrot.lane.b32.xlu0 %v1049_v49, %s1451_s0 }
0x14ce   :  { %1062 = vrot.lane.b32.xlu1 %v1060_v52, %s1451_s0 }
0x153f   :  { %v1052_v35 = vpop.permute.xlu0 %1051 }
0x1540   :  { %v1054_v46 = vadd.f32 %v1052_v35, %v1044_v1  ;;  %v1063_v59 = vpop.permute.xlu1 %1062 }
0x1541   :  { %v1065_v60 = vadd.f32 %v1063_v59, %v1055_v58 }
0x1542   :  { %1418 = vtanh.f32 %v1054_v46 }
0x1543   :  { %1420 = vtanh.f32 %v1065_v60 }
0x154c   :  { %v1419_v63 = vpop.eup %1418 }
0x154d   :  { %v1421_v26 = vpop.eup %1420  ;;  %1068 = vrot.lane.b32.xlu0 %v1419_v63, %s1451_s0 }
0x154e   :  { %1074 = vrot.lane.b32.xlu1 %v1421_v26, %s1451_s0 }
0x15bf   :  { %v1069_v53 = vpop.permute.xlu0 %1068 }
0x15c0   :  { %v1071_v55 = vmul.f32 %v1415_v24, %v1069_v53  ;;  %v1075_v28 = vpop.permute.xlu1 %1074 }
0x15c1   :  { %v1077_v0 = vmul.f32 %v1417_v37, %v1075_v28 }
0x15c2   :  { %v1078_v5 = vsel %vm185_vm2, %v1071_v55, %v1913_v16 }
0x15c3   :  { %1081 = vrot.lane.b32.xlu0 %v1078_v5, %s1452_s1  ;;  %v1079_v13 = vsel %vm178_vm1, %v1077_v0, %v1919_v32 }
0x15c4   :  { %1085 = vrot.lane.b32.xlu1 %v1079_v13, %s1453_s30 }
0x1635   :  { %v1082_v11 = vpop.permute.xlu0 %1081 }
0x1636   :  { %v1086_v15 = vpop.permute.xlu1 %1085 }
0x1637   :  { %v1088_v14 = vsel %vm333_vm3, %v1082_v11, %v1086_v15 }
0x1638   :  { %v1089_v18 = vpack.c.bf16 %v1088_v14, %v1088_v14 }
0x163a   :  { %1260 = vmatmul.mubr.msk.bf16.vlgmr.msra.gmra.mrb[28].mxu0 %vm226_vm4, %v1089_v18 }
0x170d   :  { %v1166_v20 = vpop.f32.mrb[28].mxu0 }
0x170e   :  { %v1167_v4 = vadd.f32 %v1240_v19, %v1166_v20  ;;  %v1261_v23 = vpop.f32.mrb[29].mxu0 }
0x170f   :  { %v1169_v2 = vpop.f32.mrb[30].mxu0 }
0x1710   :  { %v1262_v33 = vpop.f32.mrb[31].mxu0  ;;  %v1173_v6 = vsel %vm1172_vm12, %v1167_v4, -inf }
0x1711   :  { %1174 = vmax.xlane.f32.xlu0 %v1173_v6 }
0x179e   :  { %v1175_v7 = vpop.xlane.xlu0 %1174 }
0x179f   :  { %v1176_v8 = vsub.f32 %v1167_v4, %v1175_v7 }
0x17a1   :  { %v1177_v9 = vmul.f32 1.442695, %v1176_v8 }
0x17a3   :  { %1422 = vpow2.f32 %v1177_v9 }
0x17ad   :  { %v1423_v10 = vpop.eup %1422 }
0x17ae   :  { %v1179_v12 = vsel %vm1172_vm12, %v1423_v10, 0.0 }
0x17af   :  { %1180 = vadd.xlane.f32.xlu1 %v1179_v12 }
0x183c   :  { %v1181_v48 = vpop.xlane.xlu1 %1180 }
0x183d   :  { %1424 = vrcp.f32 %v1181_v48 }
0x1847   :  { %v1425_v16 = vpop.eup %1424 }
0x1848   :  { %v1183_v32 = vmul.f32 %v1425_v16, %v1423_v10 }
0x184a   :  { %1184 = vst.msk [vmem:[#allocation2] sm:$0xff] %vm1172_vm12, %v1183_v32 }
0x184b   :  { %1437 = shalt.err (!%p1434_p4)
}
0x184c   :  { %s1438_s20 = scalar_lea.hbm %s1984_s7, 128 }
0x184d   :  { %p1439_p5 = scmp.ne.s32.totalorder %s1984_s7, %s1438_s20  ;;  %p1442_p6 = scmp.lt.u32.totalorder %s1438_s20, %s1984_s7 }
0x184f   :  { %p1444_p7 = pnand %p1442_p6, %p1439_p5 }
0x1851   :  { %1447 = shalt.err (!%p1444_p7)
}
0x1852   :  { %1194 = dma.vmem_to_hbm [thread:$0]  %s1192_s16, 128, %s1984_s7, [#allocation3]  }
0x1853   :  { %1448 = dma.done.wait [#allocation3], 128  }
0x1854   :  { %1449 = vsyncadd [#allocation3], 4294967168 }
0x1855   :  { %1198 = vsyncpa [#allocation3], 1 }

</bundles_post_ra>
